<compile_context>
chip_gen: v7x
topology: tpu7x:2x2x1
jax: 0.10.0
libtpu: 0.0.40
codegen_flags: <defaults>
</compile_context>

<pallas_src>
import functools

import jax
import jax.numpy as jnp
from jax.experimental import pallas as pl
from jax.experimental.pallas import tpu as pltpu


def _ngcf_prop_kernel(alpha, d,
                      adj_ki_ref, adj_ik_ref,
                      rhs_u_ref, rhs_i_ref,
                      eu_i_ref, ei_i_ref,
                      inv_cs_ref, inv_rs_ref,
                      w2_ref,
                      out_u_ref, out_i_ref,
                      acc_u_ref, acc_i_ref):
    f32 = jnp.float32
    bf16 = jnp.bfloat16
    k = pl.program_id(1)

    @pl.when(k == 0)
    def _init():
        acc_u_ref[...] = jnp.zeros_like(acc_u_ref)
        acc_i_ref[...] = jnp.zeros_like(acc_i_ref)

    # Raw adjacency tiles straight to the MXU.  int8 storage is upcast through
    # f32 -> bf16 (both converts have guaranteed Mosaic lowerings); for bf16
    # storage these casts are no-ops.  No per-element normalization here.
    adj_ki = adj_ki_ref[...]                                       # (TK, TM)
    adj_ik = adj_ik_ref[...]                                       # (TM, TK)
    if adj_ki.dtype != bf16:
        adj_ki = adj_ki.astype(f32).astype(bf16)
        adj_ik = adj_ik.astype(f32).astype(bf16)

    # user direction: contract adj on axis 0 == norm_adj.T without a transpose
    acc_u_ref[...] += jax.lax.dot_general(
        adj_ki, rhs_u_ref[...], dimension_numbers=(((0,), (0,)), ((), ())),
        preferred_element_type=f32)                                # (TM, 2D)
    # item direction: plain matmul
    acc_i_ref[...] += jnp.dot(adj_ik, rhs_i_ref[...],
                              preferred_element_type=f32)          # (TM, 2D)

    @pl.when(k == pl.num_programs(1) - 1)
    def _finalize():
        w2 = w2_ref[...]
        eu_i = eu_i_ref[...]                                       # (TM, D) f32
        ei_i = ei_i_ref[...]

        # Output-side degree factor applied once per row (O(TM * 2D) work).
        acc_u = acc_u_ref[...] * inv_cs_ref[...]                   # (TM, 2D)
        agg_u = (acc_u[:, :d]
                 + jnp.dot(ei_i * acc_u[:, d:], w2, preferred_element_type=f32)
                 + eu_i)
        out_u_ref[...] = jnp.where(agg_u >= 0, agg_u, alpha * agg_u)

        acc_i = acc_i_ref[...] * inv_rs_ref[...]
        agg_i = (acc_i[:, :d]
                 + jnp.dot(eu_i * acc_i[:, d:], w2, preferred_element_type=f32)
                 + ei_i)
        out_i_ref[...] = jnp.where(agg_i >= 0, agg_i, alpha * agg_i)


def embedding_propagation(user_emb, item_emb, adj, w1, w2, alpha=0.2,
                          tile=1024, adj_is_binary=True):
    """NGCF propagation layer.  adj rows index users, columns index items.
    The reference's broadcasting is only defined for num_users == num_items.
    adj_is_binary=True stores the adjacency as int8 (exact for 0/1 graphs,
    halves the dominant HBM stream); use False for weighted adjacencies."""
    n, d = user_emb.shape
    n_i, d_i = item_emb.shape
    assert n == n_i and d == d_i, "reference broadcasting requires square adj"
    assert adj.shape == (n, n)

    f32 = jnp.float32
    user_emb = user_emb.astype(f32)
    item_emb = item_emb.astype(f32)
    w1 = w1.astype(f32)
    w2 = w2.astype(f32)

    # ---- degree factors (hoisted, exact rsqrt, zero-degree guarded) ---------
    row_sum = jnp.sum(adj, axis=1).astype(f32)                     # user degrees
    col_sum = jnp.sum(adj, axis=0).astype(f32)                     # item degrees
    inv_rs = jnp.where(row_sum > 0,
                       jax.lax.rsqrt(jnp.maximum(row_sum, 1e-30)), 0.0)[:, None]
    inv_cs = jnp.where(col_sum > 0,
                       jax.lax.rsqrt(jnp.maximum(col_sum, 1e-30)), 0.0)[:, None]

    # ---- hoisted W1 matmul + lane-concat RHS, pre-scaled contraction-side ----
    rhs_u = jnp.concatenate([item_emb @ w1, user_emb], axis=1) * inv_rs  # (N,2D)
    rhs_i = jnp.concatenate([user_emb @ w1, item_emb], axis=1) * inv_cs  # (N,2D)

    # Single cast of adj to its storage dtype (no extra f32 N^2 copy).
    store_dtype = jnp.int8 if adj_is_binary else jnp.bfloat16
    adj_s = adj.astype(store_dtype)

    # ---- tiling --------------------------------------------------------------
    n128 = ((n + 127) // 128) * 128
    tile = max(128, (int(tile) // 128) * 128)
    tile = min(tile, n128)
    n_pad = ((n + tile - 1) // tile) * tile
    pad = n_pad - n
    if pad:
        adj_s = jnp.pad(adj_s, ((0, pad), (0, pad)))
        rhs_u = jnp.pad(rhs_u, ((0, pad), (0, 0)))
        rhs_i = jnp.pad(rhs_i, ((0, pad), (0, 0)))
        user_emb = jnp.pad(user_emb, ((0, pad), (0, 0)))
        item_emb = jnp.pad(item_emb, ((0, pad), (0, 0)))
        inv_rs = jnp.pad(inv_rs, ((0, pad), (0, 0)))
        inv_cs = jnp.pad(inv_cs, ((0, pad), (0, 0)))
    rhs_u = rhs_u.astype(jnp.bfloat16)
    rhs_i = rhs_i.astype(jnp.bfloat16)

    grid = (n_pad // tile, n_pad // tile)   # (output-row tile, contraction tile)

    rhs_spec = pl.BlockSpec((tile, 2 * d), lambda i, k: (k, 0))
    emb_i = pl.BlockSpec((tile, d), lambda i, k: (i, 0))
    scale_i = pl.BlockSpec((tile, 1), lambda i, k: (i, 0))
    grid_spec = pltpu.PrefetchScalarGridSpec(
        num_scalar_prefetch=0,
        grid=grid,
        in_specs=[
            # TODO(synk): sweep pipeline_mode=pl.Buffered(3) on the adj specs
            # if an xprof trace shows exposed DMA at i-boundaries.
            pl.BlockSpec((tile, tile), lambda i, k: (k, i)),   # adj (user dir)
            pl.BlockSpec((tile, tile), lambda i, k: (i, k)),   # adj (item dir)
            rhs_spec,                                          # RHS_u (contraction rows)
            rhs_spec,                                          # RHS_i (contraction rows)
            emb_i, emb_i,                                      # E_u, E_i @ output rows
            scale_i,                                           # 1/sqrt(col_sum) @ output rows
            scale_i,                                           # 1/sqrt(row_sum) @ output rows
            pl.BlockSpec((d, d), lambda i, k: (0, 0)),         # W2
        ],
        out_specs=(pl.BlockSpec((tile, d), lambda i, k: (i, 0)),
                   pl.BlockSpec((tile, d), lambda i, k: (i, 0))),
        scratch_shapes=[pltpu.VMEM((tile, 2 * d), f32),
                        pltpu.VMEM((tile, 2 * d), f32)],
    )

    adj_bytes = jnp.dtype(store_dtype).itemsize
    n_row_blocks = n_pad // tile
    cost = pl.CostEstimate(
        flops=int(8 * n_pad * n_pad * d + 8 * n_pad * d * d),
        transcendentals=0,
        bytes_accessed=int(2 * n_pad * n_pad * adj_bytes
                           + n_row_blocks * 2 * n_pad * 2 * d * 2
                           + 8 * n_pad * d * 4),
    )

    # Per-step VMEM budget (double-buffered inputs + accumulators + outputs).
    vmem_need = (2 * 2 * tile * tile * adj_bytes        # two adj streams
                 + 2 * 2 * tile * 2 * d * 2             # RHS_u / RHS_i (bf16)
                 + 2 * 2 * tile * d * 4                 # E_u / E_i output rows
                 + 2 * tile * 2 * d * 4                 # accumulators
                 + 2 * 2 * tile * d * 4                 # outputs
                 + 2 * d * d * 4 + 8 * tile * 4)        # W2 + scales
    vmem_limit = int(min(max(2 * vmem_need, 16 * 1024 * 1024), 56 * 1024 * 1024))

    out_u, out_i = pl.pallas_call(
        functools.partial(_ngcf_prop_kernel, alpha, d),
        grid_spec=grid_spec,
        out_shape=(jax.ShapeDtypeStruct((n_pad, d), f32),
                   jax.ShapeDtypeStruct((n_pad, d), f32)),
        compiler_params=pltpu.CompilerParams(
            dimension_semantics=("parallel", "arbitrary"),
            vmem_limit_bytes=vmem_limit),
        cost_estimate=cost,
    )(adj_s, adj_s, rhs_u, rhs_i, user_emb, item_emb, inv_cs, inv_rs, w2)

    return out_u[:n], out_i[:n]


def _reference(eu, ei, adj, w1, w2, alpha):
    """Unfactored pure-JAX reference mirroring the (bmm-fixed) PyTorch order."""
    rs = adj.sum(1, keepdims=True)
    cs = adj.sum(0, keepdims=True)
    na = adj / (jnp.sqrt(rs * cs) + 1e-8)

    def msg(src, tgt, a):
        inter = src[:, None, :] * tgt[None, :, :]                  # (S, T, D)
        # actual PyTorch broadcast puts the (S, D) W1 term on the T axis:
        m = (src @ w1)[None, :, :] + jnp.einsum(
            'std,de->ste', inter, w2, precision=jax.lax.Precision.HIGHEST)
        return a[:, :, None] * m

    upd_u = jax.nn.leaky_relu(msg(ei, eu, na.T).sum(1) + eu, alpha)
    upd_i = jax.nn.leaky_relu(msg(eu, ei, na).sum(1) + ei, alpha)
    return upd_u, upd_i


if __name__ == "__main__":
    N, D = 256, 32            # num_users == num_items == 256, embedding_dim == 32
    alpha = 0.2

    key = jax.random.PRNGKey(0)
    k_u, k_i, k_a, k_w1, k_w2 = jax.random.split(key, 5)
    user_emb = jax.random.normal(k_u, (N, D), dtype=jnp.float32)
    item_emb = jax.random.normal(k_i, (N, D), dtype=jnp.float32)
    adj = jax.random.bernoulli(k_a, 0.3, (N, N)).astype(jnp.float32)
    # deterministic parameter init (torch.randn(D, D) equivalent)
    W1 = jax.random.normal(k_w1, (D, D), dtype=jnp.float32)
    W2 = jax.random.normal(k_w2, (D, D), dtype=jnp.float32)

    # tile=128 -> grid (2, 2): exercises both the parallel and reduction axes.
    upd_user, upd_item = embedding_propagation(user_emb, item_emb, adj,
                                               W1, W2, alpha, tile=128)
    jax.block_until_ready((upd_user, upd_item))

    ref_user, ref_item = _reference(user_emb, item_emb, adj, W1, W2, alpha)
    # tolerance widened slightly vs pure-f32: MXU operands are bf16 (f32 accum)
    ok = (jnp.allclose(upd_user, ref_user, rtol=5e-2, atol=1e-1) and
          jnp.allclose(upd_item, ref_item, rtol=5e-2, atol=1e-1))
    if not ok:
        err_u = float(jnp.max(jnp.abs(upd_user - ref_user)))
        err_i = float(jnp.max(jnp.abs(upd_item - ref_item)))
        raise RuntimeError(
            f"Pallas kernel does not match reference: max|du|={err_u}, max|di|={err_i}")

    print("KERNEL_OK")
</pallas_src>

<mosaic_0001>
module attributes {stable_mosaic.version = 11 : i64} {
  func.func @_ngcf_prop_kernel(%arg0: i32, %arg1: i32, %arg2: memref<128x128xi8, #tpu.memory_space<vmem>>, %arg3: memref<128x128xi8, #tpu.memory_space<vmem>>, %arg4: memref<128x64xbf16, #tpu.memory_space<vmem>>, %arg5: memref<128x64xbf16, #tpu.memory_space<vmem>>, %arg6: memref<128x32xf32, #tpu.memory_space<vmem>>, %arg7: memref<128x32xf32, #tpu.memory_space<vmem>>, %arg8: memref<128x1xf32, #tpu.memory_space<vmem>>, %arg9: memref<128x1xf32, #tpu.memory_space<vmem>>, %arg10: memref<32x32xf32, #tpu.memory_space<vmem>>, %arg11: memref<128x32xf32, #tpu.memory_space<vmem>>, %arg12: memref<128x32xf32, #tpu.memory_space<vmem>>, %arg13: memref<128x64xf32, #tpu.memory_space<vmem>>, %arg14: memref<128x64xf32, #tpu.memory_space<vmem>>) attributes {dimension_semantics = [#tpu.dimension_semantics<parallel>, #tpu.dimension_semantics<arbitrary>], iteration_bounds = array<i64: 2, 2>, scalar_prefetch = 0 : i64, scratch_operands = 2 : i64, tpu.core_type = #tpu.core_type<tc>, window_params = [{transform_indices = @transform_0, window_bounds = array<i64: 128, 128>}, {transform_indices = @transform_1, window_bounds = array<i64: 128, 128>}, {transform_indices = @transform_2, window_bounds = array<i64: 128, 64>}, {transform_indices = @transform_3, window_bounds = array<i64: 128, 64>}, {transform_indices = @transform_4, window_bounds = array<i64: 128, 32>}, {transform_indices = @transform_5, window_bounds = array<i64: 128, 32>}, {transform_indices = @transform_6, window_bounds = array<i64: 128, 1>}, {transform_indices = @transform_7, window_bounds = array<i64: 128, 1>}, {pipeline_mode = #tpu.pipeline_mode<synchronous>, transform_indices = @transform_8, window_bounds = array<i64: 32, 32>}, {transform_indices = @transform_9, window_bounds = array<i64: 128, 32>}, {transform_indices = @transform_10, window_bounds = array<i64: 128, 32>}]} {
    %c0_i32 = arith.constant 0 : i32
    %0 = arith.cmpi eq, %arg1, %c0_i32 : i32
    %1 = arith.extui %0 : i1 to i32
    %c0_i32_0 = arith.constant 0 : i32
    %2 = arith.cmpi ne, %1, %c0_i32_0 : i32
    scf.if %2 {
      %cst_18 = arith.constant 0.000000e+00 : f32
      %22 = vector.broadcast %cst_18 : f32 to vector<128x64xf32>
      %c0_19 = arith.constant 0 : index
      %c0_20 = arith.constant 0 : index
      %23 = vector.load %arg13[%c0_19, %c0_20] : memref<128x64xf32, #tpu.memory_space<vmem>>, vector<128x64xf32>
      tpu.vector_store %arg13[%c0_19, %c0_20], %22 {strides = array<i32>} : memref<128x64xf32, #tpu.memory_space<vmem>>, vector<128x64xf32>,
      %cst_21 = arith.constant 0.000000e+00 : f32
      %24 = vector.broadcast %cst_21 : f32 to vector<128x64xf32>
      %c0_22 = arith.constant 0 : index
      %c0_23 = arith.constant 0 : index
      %25 = vector.load %arg14[%c0_22, %c0_23] : memref<128x64xf32, #tpu.memory_space<vmem>>, vector<128x64xf32>
      tpu.vector_store %arg14[%c0_22, %c0_23], %24 {strides = array<i32>} : memref<128x64xf32, #tpu.memory_space<vmem>>, vector<128x64xf32>,
    } else {
    }
    %c0 = arith.constant 0 : index
    %c0_1 = arith.constant 0 : index
    %3 = vector.load %arg2[%c0, %c0_1] : memref<128x128xi8, #tpu.memory_space<vmem>>, vector<128x128xi8>
    %c0_2 = arith.constant 0 : index
    %c0_3 = arith.constant 0 : index
    %4 = vector.load %arg3[%c0_2, %c0_3] : memref<128x128xi8, #tpu.memory_space<vmem>>, vector<128x128xi8>
    %5 = arith.sitofp %3 : vector<128x128xi8> to vector<128x128xf32>
    %6 = arith.truncf %5 : vector<128x128xf32> to vector<128x128xbf16>
    %7 = arith.sitofp %4 : vector<128x128xi8> to vector<128x128xf32>
    %8 = arith.truncf %7 : vector<128x128xf32> to vector<128x128xbf16>
    %c0_4 = arith.constant 0 : index
    %c0_5 = arith.constant 0 : index
    %9 = vector.load %arg13[%c0_4, %c0_5] : memref<128x64xf32, #tpu.memory_space<vmem>>, vector<128x64xf32>
    %c0_6 = arith.constant 0 : index
    %c0_7 = arith.constant 0 : index
    %10 = vector.load %arg4[%c0_6, %c0_7] : memref<128x64xbf16, #tpu.memory_space<vmem>>, vector<128x64xbf16>
    %cst = arith.constant dense<0.000000e+00> : vector<128x64xf32>
    %11 = tpu.matmul %6, %10, %cst {dimension_numbers = #tpu.dot_dimension_numbers<[0], [0], [1], [1], [0, 1, 1, 1], [], []>} : vector<128x128xbf16>, vector<128x64xbf16>, vector<128x64xf32> -> vector<128x64xf32>
    %12 = arith.addf %9, %11 : vector<128x64xf32>
    %c0_8 = arith.constant 0 : index
    %c0_9 = arith.constant 0 : index
    %13 = vector.load %arg13[%c0_8, %c0_9] : memref<128x64xf32, #tpu.memory_space<vmem>>, vector<128x64xf32>
    tpu.vector_store %arg13[%c0_8, %c0_9], %12 {strides = array<i32>} : memref<128x64xf32, #tpu.memory_space<vmem>>, vector<128x64xf32>,
    %c0_10 = arith.constant 0 : index
    %c0_11 = arith.constant 0 : index
    %14 = vector.load %arg14[%c0_10, %c0_11] : memref<128x64xf32, #tpu.memory_space<vmem>>, vector<128x64xf32>
    %c0_12 = arith.constant 0 : index
    %c0_13 = arith.constant 0 : index
    %15 = vector.load %arg5[%c0_12, %c0_13] : memref<128x64xbf16, #tpu.memory_space<vmem>>, vector<128x64xbf16>
    %cst_14 = arith.constant dense<0.000000e+00> : vector<128x64xf32>
    %16 = tpu.matmul %8, %15, %cst_14 {dimension_numbers = #tpu.dot_dimension_numbers<[1], [0], [0], [1], [0, 0, 1, 1], [], []>} : vector<128x128xbf16>, vector<128x64xbf16>, vector<128x64xf32> -> vector<128x64xf32>
    %17 = arith.addf %14, %16 : vector<128x64xf32>
    %c0_15 = arith.constant 0 : index
    %c0_16 = arith.constant 0 : index
    %18 = vector.load %arg14[%c0_15, %c0_16] : memref<128x64xf32, #tpu.memory_space<vmem>>, vector<128x64xf32>
    tpu.vector_store %arg14[%c0_15, %c0_16], %17 {strides = array<i32>} : memref<128x64xf32, #tpu.memory_space<vmem>>, vector<128x64xf32>,
    %c1_i32 = arith.constant 1 : i32
    %19 = arith.cmpi eq, %arg1, %c1_i32 : i32
    %20 = arith.extui %19 : i1 to i32
    %c0_i32_17 = arith.constant 0 : i32
    %21 = arith.cmpi ne, %20, %c0_i32_17 : i32
    scf.if %21 {
      %c0_18 = arith.constant 0 : index
      %c0_19 = arith.constant 0 : index
      %22 = vector.load %arg10[%c0_18, %c0_19] : memref<32x32xf32, #tpu.memory_space<vmem>>, vector<32x32xf32>
      %c0_20 = arith.constant 0 : index
      %c0_21 = arith.constant 0 : index
      %23 = vector.load %arg6[%c0_20, %c0_21] : memref<128x32xf32, #tpu.memory_space<vmem>>, vector<128x32xf32>
      %c0_22 = arith.constant 0 : index
      %c0_23 = arith.constant 0 : index
      %24 = vector.load %arg7[%c0_22, %c0_23] : memref<128x32xf32, #tpu.memory_space<vmem>>, vector<128x32xf32>
      %c0_24 = arith.constant 0 : index
      %c0_25 = arith.constant 0 : index
      %25 = vector.load %arg13[%c0_24, %c0_25] : memref<128x64xf32, #tpu.memory_space<vmem>>, vector<128x64xf32>
      %c0_26 = arith.constant 0 : index
      %c0_27 = arith.constant 0 : index
      %26 = vector.load %arg8[%c0_26, %c0_27] : memref<128x1xf32, #tpu.memory_space<vmem>>, vector<128x1xf32>
      %27 = vector.broadcast %26 : vector<128x1xf32> to vector<128x64xf32>
      %28 = arith.mulf %25, %27 : vector<128x64xf32>
      %29 = vector.extract_strided_slice %28 {offsets = [0, 0], sizes = [128, 32], strides = [1, 1]} : vector<128x64xf32> to vector<128x32xf32>
      %30 = vector.extract_strided_slice %28 {offsets = [0, 32], sizes = [128, 32], strides = [1, 1]} : vector<128x64xf32> to vector<128x32xf32>
      %31 = arith.mulf %24, %30 : vector<128x32xf32>
      %cst_28 = arith.constant dense<0.000000e+00> : vector<128x32xf32>
      %32 = tpu.matmul %31, %22, %cst_28 {dimension_numbers = #tpu.dot_dimension_numbers<[1], [0], [0], [1], [0, 0, 1, 1], [], []>} : vector<128x32xf32>, vector<32x32xf32>, vector<128x32xf32> -> vector<128x32xf32>
      %33 = arith.addf %29, %32 : vector<128x32xf32>
      %34 = arith.addf %33, %23 : vector<128x32xf32>
      %cst_29 = arith.constant 0.000000e+00 : f32
      %35 = vector.broadcast %cst_29 : f32 to vector<128x32xf32>
      %36 = arith.cmpf oge, %34, %35 : vector<128x32xf32>
      %cst_30 = arith.constant 2.000000e-01 : f32
      %37 = vector.broadcast %cst_30 : f32 to vector<128x32xf32>
      %38 = arith.mulf %37, %34 : vector<128x32xf32>
      %39 = arith.select %36, %34, %38 : vector<128x32xi1>, vector<128x32xf32>
      %c0_31 = arith.constant 0 : index
      %c0_32 = arith.constant 0 : index
      %40 = vector.load %arg11[%c0_31, %c0_32] : memref<128x32xf32, #tpu.memory_space<vmem>>, vector<128x32xf32>
      tpu.vector_store %arg11[%c0_31, %c0_32], %39 {strides = array<i32>} : memref<128x32xf32, #tpu.memory_space<vmem>>, vector<128x32xf32>,
      %c0_33 = arith.constant 0 : index
      %c0_34 = arith.constant 0 : index
      %41 = vector.load %arg14[%c0_33, %c0_34] : memref<128x64xf32, #tpu.memory_space<vmem>>, vector<128x64xf32>
      %c0_35 = arith.constant 0 : index
      %c0_36 = arith.constant 0 : index
      %42 = vector.load %arg9[%c0_35, %c0_36] : memref<128x1xf32, #tpu.memory_space<vmem>>, vector<128x1xf32>
      %43 = vector.broadcast %42 : vector<128x1xf32> to vector<128x64xf32>
      %44 = arith.mulf %41, %43 : vector<128x64xf32>
      %45 = vector.extract_strided_slice %44 {offsets = [0, 0], sizes = [128, 32], strides = [1, 1]} : vector<128x64xf32> to vector<128x32xf32>
      %46 = vector.extract_strided_slice %44 {offsets = [0, 32], sizes = [128, 32], strides = [1, 1]} : vector<128x64xf32> to vector<128x32xf32>
      %47 = arith.mulf %23, %46 : vector<128x32xf32>
      %cst_37 = arith.constant dense<0.000000e+00> : vector<128x32xf32>
      %48 = tpu.matmul %47, %22, %cst_37 {dimension_numbers = #tpu.dot_dimension_numbers<[1], [0], [0], [1], [0, 0, 1, 1], [], []>} : vector<128x32xf32>, vector<32x32xf32>, vector<128x32xf32> -> vector<128x32xf32>
      %49 = arith.addf %45, %48 : vector<128x32xf32>
      %50 = arith.addf %49, %24 : vector<128x32xf32>
      %cst_38 = arith.constant 0.000000e+00 : f32
      %51 = vector.broadcast %cst_38 : f32 to vector<128x32xf32>
      %52 = arith.cmpf oge, %50, %51 : vector<128x32xf32>
      %cst_39 = arith.constant 2.000000e-01 : f32
      %53 = vector.broadcast %cst_39 : f32 to vector<128x32xf32>
      %54 = arith.mulf %53, %50 : vector<128x32xf32>
      %55 = arith.select %52, %50, %54 : vector<128x32xi1>, vector<128x32xf32>
      %c0_40 = arith.constant 0 : index
      %c0_41 = arith.constant 0 : index
      %56 = vector.load %arg12[%c0_40, %c0_41] : memref<128x32xf32, #tpu.memory_space<vmem>>, vector<128x32xf32>
      tpu.vector_store %arg12[%c0_40, %c0_41], %55 {strides = array<i32>} : memref<128x32xf32, #tpu.memory_space<vmem>>, vector<128x32xf32>,
    } else {
    }
    return
  }
  func.func @transform_0(%arg0: i32, %arg1: i32) -> (i32, i32) {
    %c0_i32 = arith.constant 0 : i32
    return %arg1, %arg0 : i32, i32
  }
  func.func @transform_1(%arg0: i32, %arg1: i32) -> (i32, i32) {
    %c0_i32 = arith.constant 0 : i32
    return %arg0, %arg1 : i32, i32
  }
  func.func @transform_2(%arg0: i32, %arg1: i32) -> (i32, i32) {
    %c0_i32 = arith.constant 0 : i32
    %c0_i32_0 = arith.constant 0 : i32
    return %arg1, %c0_i32 : i32, i32
  }
  func.func @transform_3(%arg0: i32, %arg1: i32) -> (i32, i32) {
    %c0_i32 = arith.constant 0 : i32
    %c0_i32_0 = arith.constant 0 : i32
    return %arg1, %c0_i32 : i32, i32
  }
  func.func @transform_4(%arg0: i32, %arg1: i32) -> (i32, i32) {
    %c0_i32 = arith.constant 0 : i32
    %c0_i32_0 = arith.constant 0 : i32
    return %arg0, %c0_i32 : i32, i32
  }
  func.func @transform_5(%arg0: i32, %arg1: i32) -> (i32, i32) {
    %c0_i32 = arith.constant 0 : i32
    %c0_i32_0 = arith.constant 0 : i32
    return %arg0, %c0_i32 : i32, i32
  }
  func.func @transform_6(%arg0: i32, %arg1: i32) -> (i32, i32) {
    %c0_i32 = arith.constant 0 : i32
    %c0_i32_0 = arith.constant 0 : i32
    return %arg0, %c0_i32 : i32, i32
  }
  func.func @transform_7(%arg0: i32, %arg1: i32) -> (i32, i32) {
    %c0_i32 = arith.constant 0 : i32
    %c0_i32_0 = arith.constant 0 : i32
    return %arg0, %c0_i32 : i32, i32
  }
  func.func @transform_8(%arg0: i32, %arg1: i32) -> (i32, i32) {
    %c0_i32 = arith.constant 0 : i32
    %c0_i32_0 = arith.constant 0 : i32
    %c0_i32_1 = arith.constant 0 : i32
    return %c0_i32, %c0_i32_0 : i32, i32
  }
  func.func @transform_9(%arg0: i32, %arg1: i32) -> (i32, i32) {
    %c0_i32 = arith.constant 0 : i32
    %c0_i32_0 = arith.constant 0 : i32
    return %arg0, %c0_i32 : i32, i32
  }
  func.func @transform_10(%arg0: i32, %arg1: i32) -> (i32, i32) {
    %c0_i32 = arith.constant 0 : i32
    %c0_i32_0 = arith.constant 0 : i32
    return %arg0, %c0_i32 : i32, i32
  }
}

</mosaic_0001>

<bundles_post_ra>
// kernel: tpu_custom_call.1
= control target key start
LH: loop header
LB: loop body
LE: loop exit
PB: predicated region body
PF: predicated region fallthrough
CT: control target
= control target key end

     0   :  { %s3563_s0 = inlined_call_operand.vmem [shape: s8[256,256], index: 0, kind: input, shape index: {}]   ;;  %s3564_s1 = inlined_call_operand.vmem [shape: s8[256,256], index: 1, kind: input, shape index: {}]   ;;  %s3565_s2 = inlined_call_operand.vmem [shape: bf16[256,64], index: 2, kind: input, shape index: {}]   ;;  %s3566_s3 = inlined_call_operand.vmem [shape: bf16[256,64], index: 3, kind: input, shape index: {}]   ;;  %s3567_s4 = inlined_call_operand.vmem [shape: f32[256,32], index: 4, kind: input, shape index: {}]   ;;  %s3568_s5 = inlined_call_operand.vmem [shape: f32[256,32], index: 5, kind: input, shape index: {}]   ;;  %s3569_s6 = inlined_call_operand.vmem [shape: f32[256,1], index: 6, kind: input, shape index: {}]   ;;  %s3570_s7 = inlined_call_operand.vmem [shape: f32[256,1], index: 7, kind: input, shape index: {}]   ;;  %s3571_s8 = inlined_call_operand.vmem [shape: f32[32,32], index: 8, kind: input, shape index: {}]   ;;  %s3572_s9 = inlined_call_operand.vmem [shape: f32[256,32], index: 9, kind: output, shape index: {0}]   ;;  %s3573_s10 = inlined_call_operand.vmem [shape: f32[256,32], index: 10, kind: output, shape index: {1}]  }
   0x1   :  { %3589 = sst [smem:[#allocation21_spill]] %s3563_s0 }
   0x2   :  { %3590 = sst [smem:[#allocation22_spill]] %s3564_s1 }
   0x3   :  { %3591 = sst [smem:[#allocation23_spill]] %s3565_s2 }
   0x4   :  { %3592 = sst [smem:[#allocation24_spill]] %s3566_s3 }
   0x5   :  { %3593 = sst [smem:[#allocation25_spill]] %s3567_s4 }
   0x6   :  { %s2869_s13 = smov 0   ;;  %s2871_s14 = smov 0  }
   0x7   :  { %s2873_s15 = smov 0   ;;  %s2875_s16 = smov 0  }
   0x8   :  { %s2877_s17 = smov 0   ;;  %s2879_s18 = smov 0  }
   0x9   :  { %s2881_s19 = smov 0  }
   0xa LB: > { %s30_s20 = sadd.s32 1, %s2801_s17  ;;  %s33_s21 = sadd.s32 1, %s2805_s18  ;;  %s2809_s19 = sphi %s2881_s19, %s21_s19   ;;  %s2805_s18 = sphi %s2879_s18, %s3635_s18   ;;  %s2801_s17 = sphi %s2877_s17, %s3634_s17   ;;  %s2797_s16 = sphi %s2875_s16, %s3633_s16   ;;  %s2793_s15 = sphi %s2873_s15, %s3632_s15   ;;  %s2789_s14 = sphi %s2871_s14, %s3631_s14   ;;  %s2785_s13 = sphi %s2869_s13, %s3630_s13  }
   0xb   : > { %p31_p0 = scmp.ge.s32.totalorder %s30_s20, 2  ;;  %p49_p1 = scmp.ne.s32.totalorder %s2789_s14, %s2785_s13 }
   0xc   : > { %p50_p2 = scmp.eq.s32.totalorder %s2809_s19, 0  ;;  %s42_s26 = sadd.s32 1, %s2789_s14 }
   0xd   : > { %s3637_s20 = smov (%p31_p0, %s30_s20), 0  ;;  %s3639_s21 = smov (!%p31_p0, %s33_s21), %s2805_s18 }
   0xe   : > { %3594 = sst [smem:[#allocation6_spill]] %s3637_s20  ;;  %p2912_p3 = por %p50_p2, %p49_p1 }
   0xf   : > { %p35_p4 = scmp.ge.s32.totalorder %s3639_s21, 2  ;;  %s37_s23 = ssub.s32 %s2801_s17, %s3637_s20 }
  0x10   : > { %p2380_p6 = scmp.ge.s32.totalorder %s2809_s19, 4 }
  0x11   : > { %s3641_s21 = smov (%p35_p4, %s3639_s21), 0 }
  0x12   : > { %3596 = sst [smem:[#allocation7_spill]] %s3641_s21  ;;  %s38_s24 = ssub.s32 %s2805_s18, %s3641_s21 }
  0x13   : > { %s39_s25 = sor.u32 %s38_s24, %s37_s23  ;;  %335 = sbr.rel (%p2380_p6) target bundleno = 50 (0x32), region = 20 }
  0x14   : > { %p40_p5 = scmp.eq.s32.totalorder %s39_s25, 0 }
  0x16   : > { %s2924_s27 = scalar_select %p40_p5, %s2789_s14, %s42_s26  }
  0x1a   : > { %338 = sbr.rel (!%p2912_p3) target bundleno = 38 (0x26), region = 24  ;;  %s340_s28 = sand.u32 (%p2912_p3), 1, %s2789_s14  }
  0x1b   : > { %s2460_s29 = sshll.u32 (%p2912_p3), %s2801_s17, 3  ;;  %s2381_s30 = sshll.u32 (%p2912_p3), %s340_s28, 5 }
  0x1c   : > { %s345_s11 = sadd.s32 (%p2912_p3), %s2805_s18, %s2460_s29  ;;  %s3597_s0 = sld [smem:[#allocation21_spill]] (%p2912_p3) }
  0x1d   : > { %s2384_s12 = sshll.u32 (%p2912_p3), %s345_s11, 3  ;;  %s342_s25 = scalar_lea.vmem (%p2912_p3), [#allocation4], %s2381_s30 }
  0x22   : > { %s347_s24 = scalar_lea.vmem %s3597_s0, %s2384_s12 }
  0x23   : > { %v381_v0 = vld [vmem:[%s347_s24] sm:$0xff]  ;;  %v383_v1 = vld [vmem:[%s347_s24 + $0x10] sm:$0xff] }
  0x24   : > { %v385_v2 = vld [vmem:[%s347_s24 + $0x20] sm:$0xff]  ;;  %382 = vst [vmem:[%s342_s25] sm:$0xff] %v381_v0  ;;  %384 = vst [vmem:[%s342_s25 + $0x8] sm:$0xff] %v383_v1  ;;  %v387_v3 = vld [vmem:[%s347_s24 + $0x30] sm:$0xff] }
  0x25   : > { %386 = vst [vmem:[%s342_s25 + $0x10] sm:$0xff] %v385_v2  ;;  %388 = vst [vmem:[%s342_s25 + $0x18] sm:$0xff] %v387_v3 }
  0x26 PF: > { %394 = sbr.rel (!%p2912_p3) target bundleno = 50 (0x32), region = 62  ;;  %s396_s26 = sand.u32 (%p2912_p3), 1, %s2789_s14  }
  0x27   : > { %s2461_s28 = sshll.u32 (%p2912_p3), %s2805_s18, 3  ;;  %s2385_s21 = sshll.u32 (%p2912_p3), %s396_s26, 5 }
  0x28   : > { %s401_s29 = sadd.s32 (%p2912_p3), %s2801_s17, %s2461_s28  ;;  %s3598_s1 = sld [smem:[#allocation22_spill]] (%p2912_p3) }
  0x29   : > { %s2388_s11 = sshll.u32 (%p2912_p3), %s401_s29, 3  ;;  %s398_s24 = scalar_lea.vmem (%p2912_p3), [#allocation5], %s2385_s21 }
  0x2e   : > { %s403_s30 = scalar_lea.vmem %s3598_s1, %s2388_s11 }
  0x2f   : > { %v437_v4 = vld [vmem:[%s403_s30] sm:$0xff]  ;;  %v439_v5 = vld [vmem:[%s403_s30 + $0x10] sm:$0xff] }
  0x30   : > { %v441_v6 = vld [vmem:[%s403_s30 + $0x20] sm:$0xff]  ;;  %438 = vst [vmem:[%s398_s24] sm:$0xff] %v437_v4  ;;  %440 = vst [vmem:[%s398_s24 + $0x8] sm:$0xff] %v439_v5  ;;  %v443_v7 = vld [vmem:[%s403_s30 + $0x30] sm:$0xff] }
  0x31   : > { %442 = vst [vmem:[%s398_s24 + $0x10] sm:$0xff] %v441_v6  ;;  %444 = vst [vmem:[%s398_s24 + $0x18] sm:$0xff] %v443_v7 }
  0x32 PF: > { %p2389_p7 = scmp.ge.s32.totalorder %s2809_s19, 1  ;;  %p503_p8 = scmp.lt.s32.totalorder %s2809_s19, 5 }
  0x34   : > { %p504_p9 = pnand %p2389_p7, %p503_p8 }
  0x35   : > { %s510_s22 = sand.u32 (!%p504_p9), 1, %s2785_s13   ;;  %s2392_s25 = sshll.u32 (!%p504_p9), %s2793_s15, 4 }
  0x36   : > { %507 = sbr.rel (%p504_p9) target bundleno = 965 (0x3c5), region = 124  ;;  %s2390_s26 = sshll.u32 (!%p504_p9), %s510_s22, 5 }
  0x37   : > { %p596_p10 = scmp.lt.s32.totalorder (!%p504_p9), %s2392_s25, 31  ;;  %s2396_s28 = sshll.u32 (!%p504_p9), %s2797_s16, 4 }
  0x38   : > { %p608_p11 = scmp.lt.s32.totalorder (!%p504_p9), %s2396_s28, 31  ;;  %s3599_s2 = sld [smem:[#allocation23_spill]] (!%p504_p9) }
  0x39   : > { %s3600_s3 = sld [smem:[#allocation24_spill]] (!%p504_p9)  ;;  %s3601_s4 = sld [smem:[#allocation25_spill]] (!%p504_p9) }
  0x3a   : > { %s2990_s29 = scalar_lea.vmem (!%p504_p9), [#allocation5], %s2390_s26  ;;  %p2408_p12 = scmp.ne.s32.totalorder (!%p504_p9), %s2793_s15, 0 }
  0x3d   : > { %s3643_s25 = smov (!%p596_p10, %s2392_s25), 31  ;;  %s3645_s28 = smov (!%p608_p11, %s2396_s28), 31 }
  0x3e   : > { %s2393_s21 = sshll.u32 %s3643_s25, 2  ;;  %s2397_s0 = sshll.u32 %s3645_s28, 3  ;;  %vm648_vm0 = vcmask (!%p2408_p12), 523264   ;;  %v2811_v8 = vmov (!%p2408_p12), 0.0  }
  0x3f   : > { %s2951_s12 = scalar_lea.vmem %s3599_s2, %s2393_s21  ;;  %s2956_s24 = scalar_lea.vmem %s3600_s3, %s2393_s21  ;;  %649 = vst.msk [vmem:[#allocation2] sm:$0xff] (!%p2408_p12), %vm648_vm0, %v2811_v8  ;;  %650 = vst.msk [vmem:[#allocation2 + $0x8] sm:$0xff] (!%p2408_p12), %vm648_vm0, %v2811_v8 }
  0x40   : > { %s2961_s22 = scalar_lea.vmem %s3601_s4, %s2397_s0  ;;  %s2966_s20 = scalar_lea.vmem %s3568_s5, %s2397_s0  ;;  %651 = vst.msk [vmem:[#allocation2 + $0x10] sm:$0xff] (!%p2408_p12), %vm648_vm0, %v2811_v8  ;;  %652 = vst.msk [vmem:[#allocation2 + $0x18] sm:$0xff] (!%p2408_p12), %vm648_vm0, %v2811_v8 }
  0x41   : > { %s2971_s2 = scalar_lea.vmem %s3569_s6, %s2397_s0  ;;  %s2976_s30 = scalar_lea.vmem %s3570_s7, %s2397_s0  ;;  %653 = vst.msk [vmem:[#allocation2 + $0x20] sm:$0xff] (!%p2408_p12), %vm648_vm0, %v2811_v8  ;;  %654 = vst.msk [vmem:[#allocation2 + $0x28] sm:$0xff] (!%p2408_p12), %vm648_vm0, %v2811_v8 }
  0x42   : > { %s2981_s1 = scalar_lea.vmem %s3572_s9, %s2397_s0  ;;  %s2986_s16 = scalar_lea.vmem %s3573_s10, %s2397_s0  ;;  %655 = vst.msk [vmem:[#allocation2 + $0x30] sm:$0xff] (!%p2408_p12), %vm648_vm0, %v2811_v8  ;;  %656 = vst.msk [vmem:[#allocation2 + $0x38] sm:$0xff] (!%p2408_p12), %vm648_vm0, %v2811_v8 }
  0x43   : > { %s2988_s25 = scalar_lea.vmem [#allocation4], %s2390_s26  ;;  %647 = sbr.rel (%p2408_p12) target bundleno = 79 (0x4f), region = 136  ;;  %657 = vst.msk [vmem:[#allocation2 + $0x40] sm:$0xff] (!%p2408_p12), %vm648_vm0, %v2811_v8  ;;  %658 = vst.msk [vmem:[#allocation2 + $0x48] sm:$0xff] (!%p2408_p12), %vm648_vm0, %v2811_v8 }
  0x44   : > { %659 = vst.msk [vmem:[#allocation2 + $0x50] sm:$0xff] (!%p2408_p12), %vm648_vm0, %v2811_v8  ;;  %660 = vst.msk [vmem:[#allocation2 + $0x58] sm:$0xff] (!%p2408_p12), %vm648_vm0, %v2811_v8 }
  0x45   : > { %661 = vst.msk [vmem:[#allocation2 + $0x60] sm:$0xff] (!%p2408_p12), %vm648_vm0, %v2811_v8  ;;  %662 = vst.msk [vmem:[#allocation2 + $0x68] sm:$0xff] (!%p2408_p12), %vm648_vm0, %v2811_v8 }
  0x46   : > { %663 = vst.msk [vmem:[#allocation2 + $0x70] sm:$0xff] (!%p2408_p12), %vm648_vm0, %v2811_v8  ;;  %664 = vst.msk [vmem:[#allocation2 + $0x78] sm:$0xff] (!%p2408_p12), %vm648_vm0, %v2811_v8 }
  0x47   : > { %665 = vst.msk [vmem:[#allocation3] sm:$0xff] (!%p2408_p12), %vm648_vm0, %v2811_v8  ;;  %666 = vst.msk [vmem:[#allocation3 + $0x8] sm:$0xff] (!%p2408_p12), %vm648_vm0, %v2811_v8 }
  0x48   : > { %667 = vst.msk [vmem:[#allocation3 + $0x10] sm:$0xff] (!%p2408_p12), %vm648_vm0, %v2811_v8  ;;  %668 = vst.msk [vmem:[#allocation3 + $0x18] sm:$0xff] (!%p2408_p12), %vm648_vm0, %v2811_v8 }
  0x49   : > { %669 = vst.msk [vmem:[#allocation3 + $0x20] sm:$0xff] (!%p2408_p12), %vm648_vm0, %v2811_v8  ;;  %670 = vst.msk [vmem:[#allocation3 + $0x28] sm:$0xff] (!%p2408_p12), %vm648_vm0, %v2811_v8 }
  0x4a   : > { %671 = vst.msk [vmem:[#allocation3 + $0x30] sm:$0xff] %vm648_vm0, %v2811_v8  ;;  %672 = vst.msk [vmem:[#allocation3 + $0x38] sm:$0xff] %vm648_vm0, %v2811_v8 }
  0x4b   : > { %673 = vst.msk [vmem:[#allocation3 + $0x40] sm:$0xff] %vm648_vm0, %v2811_v8  ;;  %674 = vst.msk [vmem:[#allocation3 + $0x48] sm:$0xff] %vm648_vm0, %v2811_v8 }
  0x4c   : > { %675 = vst.msk [vmem:[#allocation3 + $0x50] sm:$0xff] %vm648_vm0, %v2811_v8  ;;  %676 = vst.msk [vmem:[#allocation3 + $0x58] sm:$0xff] %vm648_vm0, %v2811_v8 }
  0x4d   : > { %677 = vst.msk [vmem:[#allocation3 + $0x60] sm:$0xff] %vm648_vm0, %v2811_v8  ;;  %678 = vst.msk [vmem:[#allocation3 + $0x68] sm:$0xff] %vm648_vm0, %v2811_v8 }
  0x4e   : > { %679 = vst.msk [vmem:[#allocation3 + $0x70] sm:$0xff] %vm648_vm0, %v2811_v8  ;;  %680 = vst.msk [vmem:[#allocation3 + $0x78] sm:$0xff] %vm648_vm0, %v2811_v8 }
  0x4f PF: > { %v681_v9 = vld [vmem:[%s2988_s25] sm:$0xff]  ;;  %v682_v11 = vld [vmem:[%s2988_s25 + $0x8] sm:$0xff]  ;;  %v2741_v17 = vld [vmem:[%s2956_s24 + $0x10] sm:$0xff]   ;;  %vm914_vm1 = vcmask 523264   ;;  %p2425_p13 = scmp.ne.s32.totalorder %s2793_s15, 1 }
  0x50   : > { %v689_v10 = vunpack.c.l.s8.bf16 %v681_v9  ;;  %v2737_v12 = vld [vmem:[%s2956_s24] sm:$0xff]   ;;  %v690_v13 = vunpack.c.h.s8.bf16 %v681_v9  ;;  %v2739_v15 = vld [vmem:[%s2956_s24 + $0x8] sm:$0xff]   ;;  %v691_v18 = vunpack.c.l.s8.bf16 %v682_v11  ;;  %v2742_v19 = vld [vmem:[%s2951_s12 + $0x10] sm:$0xff]   ;;  %v692_v21 = vunpack.c.h.s8.bf16 %v682_v11 }
  0x51   : > { %v2738_v14 = vld [vmem:[%s2951_s12] sm:$0xff]   ;;  %2566 = vmatprep.subr.bf16.mxu1 %v2737_v12  ;;  %v2740_v16 = vld [vmem:[%s2951_s12 + $0x8] sm:$0xff]   ;;  %v2743_v20 = vld [vmem:[%s2956_s24 + $0x18] sm:$0xff]  }
  0x52   : > { %737 = vxpose.xlu0.c.b16.start [1/8] %v689_v10, 128  ;;  %2567 = vmatpush3.bf16.msra.mxu1 %v2737_v12  ;;  %v2744_v22 = vld [vmem:[%s2951_s12 + $0x18] sm:$0xff]   ;;  %v683_v23 = vld [vmem:[%s2988_s25 + $0x10] sm:$0xff]  ;;  %v2745_v24 = vld [vmem:[%s2956_s24 + $0x20] sm:$0xff]  }
  0x53   : > { %2534 = vmatprep.subr.bf16.mxu0 %v2738_v14  ;;  %2568 = vmatprep.subr.bf16.mxu1 %v2739_v15  ;;  %v693_v25 = vunpack.c.l.s8.bf16 %v683_v23  ;;  %v2746_v26 = vld [vmem:[%s2951_s12 + $0x20] sm:$0xff]   ;;  %v2747_v28 = vld [vmem:[%s2956_s24 + $0x28] sm:$0xff]   ;;  %v694_v30 = vunpack.c.h.s8.bf16 %v683_v23  ;;  %v684_v32 = vld [vmem:[%s2988_s25 + $0x18] sm:$0xff] }
  0x54   : > { %2535 = vmatpush3.bf16.msra.mxu0 %v2738_v14  ;;  %v685_v27 = vld [vmem:[%s2990_s29] sm:$0xff]  ;;  %v2748_v31 = vld [vmem:[%s2951_s12 + $0x28] sm:$0xff]   ;;  %v2749_v33 = vld [vmem:[%s2956_s24 + $0x30] sm:$0xff]   ;;  %v695_v34 = vunpack.c.l.s8.bf16 %v684_v32  ;;  %v696_v37 = vunpack.c.h.s8.bf16 %v684_v32 }
  0x55   : > { %2536 = vmatprep.subr.bf16.mxu0 %v2740_v16  ;;  %v697_v29 = vunpack.c.l.s8.bf16 %v685_v27  ;;  %v2750_v35 = vld [vmem:[%s2951_s12 + $0x30] sm:$0xff]   ;;  %v2751_v36 = vld [vmem:[%s2956_s24 + $0x38] sm:$0xff]   ;;  %v686_v39 = vld [vmem:[%s2990_s29 + $0x8] sm:$0xff]  ;;  %v698_v40 = vunpack.c.h.s8.bf16 %v685_v27 }
  0x56   : > { %738 = vxpose.xlu0.c.b16.cont [2/8] %v690_v13, 128  ;;  %2569 = vmatpush3.bf16.msra.mxu1 %v2739_v15  ;;  %v2752_v38 = vld [vmem:[%s2951_s12 + $0x38] sm:$0xff]   ;;  %v699_v41 = vunpack.c.l.s8.bf16 %v686_v39  ;;  %v687_v42 = vld [vmem:[%s2990_s29 + $0x10] sm:$0xff]  ;;  %v700_v43 = vunpack.c.h.s8.bf16 %v686_v39  ;;  %v931_v58 = vld [vmem:[#allocation3] sm:$0xff] }
  0x57   : > { %2570 = vmatprep.subr.bf16.mxu1 %v2741_v17  ;;  %2582 = vmatprep.mubr.bf16.mxu1 %v697_v29  ;;  %v701_v44 = vunpack.c.l.s8.bf16 %v687_v42  ;;  %v688_v45 = vld [vmem:[%s2990_s29 + $0x18] sm:$0xff]  ;;  %v702_v46 = vunpack.c.h.s8.bf16 %v687_v42  ;;  %v933_v57 = vld [vmem:[#allocation3 + $0x10] sm:$0xff]  ;;  %v932_v63 = vld [vmem:[#allocation3 + $0x8] sm:$0xff] }
  0x58   : > { %2537 = vmatpush3.bf16.msra.mxu0 %v2740_v16  ;;  %v703_v47 = vunpack.c.l.s8.bf16 %v688_v45  ;;  %v704_v48 = vunpack.c.h.s8.bf16 %v688_v45  ;;  %v934_v60 = vld [vmem:[#allocation3 + $0x18] sm:$0xff]  ;;  %v937_v5 = vld [vmem:[#allocation3 + $0x30] sm:$0xff]  ;;  %v935_v6 = vld [vmem:[#allocation3 + $0x20] sm:$0xff] }
  0x59   : > { %2538 = vmatprep.subr.bf16.mxu0 %v2742_v19  ;;  %v938_v8 = vld [vmem:[#allocation3 + $0x38] sm:$0xff]  ;;  %v936_v11 = vld [vmem:[#allocation3 + $0x28] sm:$0xff]  ;;  %v945_v29 = vld [vmem:[#allocation3 + $0x70] sm:$0xff] }
  0x5a   : > { %739 = vxpose.xlu0.c.b16.cont [3/8] %v691_v18, 128  ;;  %2571 = vmatpush3.bf16.msra.mxu1 %v2741_v17  ;;  %v941_v17 = vld [vmem:[#allocation3 + $0x50] sm:$0xff]  ;;  %v939_v18 = vld [vmem:[#allocation3 + $0x40] sm:$0xff]  ;;  %v940_v23 = vld [vmem:[#allocation3 + $0x48] sm:$0xff] }
  0x5b   : > { %2572 = vmatprep.subr.bf16.mxu1 %v2743_v20  ;;  %v946_v32 = vld [vmem:[#allocation3 + $0x78] sm:$0xff]  ;;  %v705_v42 = vld [vmem:[#allocation2] sm:$0xff] }
  0x5c   : > { %2539 = vmatpush3.bf16.msra.mxu0 %v2742_v19 }
  0x5d   : > { %2540 = vmatprep.subr.bf16.mxu0 %v2744_v22 }
  0x5e   : > { %740 = vxpose.xlu0.c.b16.cont [4/8] %v692_v21, 128  ;;  %2573 = vmatpush3.bf16.msra.mxu1 %v2743_v20  ;;  %v942_v20 = vld [vmem:[#allocation3 + $0x58] sm:$0xff] }
  0x5f   : > { %2574 = vmatprep.subr.bf16.mxu1 %v2745_v24 }
  0x60   : > { %2541 = vmatpush3.bf16.msra.mxu0 %v2744_v22 }
  0x61   : > { %2542 = vmatprep.subr.bf16.mxu0 %v2746_v26 }
  0x62   : > { %741 = vxpose.xlu0.c.b16.cont [5/8] %v693_v25, 128  ;;  %2575 = vmatpush3.bf16.msra.mxu1 %v2745_v24 }
  0x63   : > { %2576 = vmatprep.subr.bf16.mxu1 %v2747_v28 }
  0x64   : > { %2543 = vmatpush3.bf16.msra.mxu0 %v2746_v26 }
  0x65   : > { %2544 = vmatprep.subr.bf16.mxu0 %v2748_v31 }
  0x66   : > { %742 = vxpose.xlu0.c.b16.cont [6/8] %v694_v30, 128  ;;  %2577 = vmatpush3.bf16.msra.mxu1 %v2747_v28  ;;  %v943_v30 = vld [vmem:[#allocation3 + $0x60] sm:$0xff] }
  0x67   : > { %2578 = vmatprep.subr.bf16.mxu1 %v2749_v33 }
  0x68   : > { %2545 = vmatpush3.bf16.msra.mxu0 %v2748_v31 }
  0x69   : > { %2546 = vmatprep.subr.bf16.mxu0 %v2750_v35 }
  0x6a   : > { %743 = vxpose.xlu0.c.b16.cont [7/8] %v695_v34, 128  ;;  %2579 = vmatpush3.bf16.msra.mxu1 %v2749_v33 }
  0x6b   : > { %2580 = vmatprep.subr.bf16.mxu1 %v2751_v36 }
  0x6c   : > { %2547 = vmatpush3.bf16.msra.mxu0 %v2750_v35  ;;  %v944_v35 = vld [vmem:[#allocation3 + $0x68] sm:$0xff] }
  0x6d   : > { %2548 = vmatprep.subr.bf16.mxu0 %v2752_v38 }
  0x6e   : > { %744 = vxpose.xlu0.c.b16.end [8/8] %v696_v37, 128  ;;  %2581 = vmatpush3.bf16.msra.mxu1 %v2751_v36 }
  0x70   : > { %2549 = vmatpush3.bf16.msra.mxu0 %v2752_v38 }
  0x71   : > { %2583 = vmatmul.mubr.bf16.vlgmr.msra.gmra.mrb[0].mxu1 %v698_v40 }
  0x72   : > { %2586 = vmatprep.mubr.bf16.mxu1 %v699_v41  ;;  %v707_v41 = vld [vmem:[#allocation2 + $0x10] sm:$0xff] }
  0x79   : > { %2587 = vmatmul.mubr.bf16.gmra.mrb[4].mxu1 %v700_v43 }
  0x7a   : > { %2590 = vmatprep.mubr.bf16.mxu1 %v701_v44  ;;  %v708_v44 = vld [vmem:[#allocation2 + $0x18] sm:$0xff] }
  0x81   : > { %2591 = vmatmul.mubr.bf16.gmra.mrb[8].mxu1 %v702_v46 }
  0x82   : > { %2594 = vmatprep.mubr.bf16.mxu1 %v703_v47  ;;  %v706_v47 = vld [vmem:[#allocation2 + $0x8] sm:$0xff] }
  0x89   : > { %2595 = vmatmul.mubr.bf16.gmra.mrb[12].mxu1 %v704_v48 }
  0xb8   : > { %v745_v49 = vpop.trf.xlu0 }
  0xb9   : > { %2550 = vmatprep.mubr.bf16.mxu0 %v745_v49 }
  0xbc   : > { %v746_v50 = vpop.trf.xlu0 }
  0xbd   : > { %2551 = vmatmul.mubr.bf16.vlgmr.msra.gmra.mrb[0].mxu0 %v746_v50 }
  0xc0   : > { %v747_v51 = vpop.trf.xlu0 }
  0xc1   : > { %2554 = vmatprep.mubr.bf16.mxu0 %v747_v51 }
  0xc4   : > { %v748_v52 = vpop.trf.xlu0 }
  0xc5   : > { %2555 = vmatmul.mubr.bf16.gmra.mrb[4].mxu0 %v748_v52 }
  0xc8   : > { %v749_v53 = vpop.trf.xlu0 }
  0xc9   : > { %2558 = vmatprep.mubr.bf16.mxu0 %v749_v53  ;;  %v711_v53 = vld [vmem:[#allocation2 + $0x30] sm:$0xff] }
  0xcc   : > { %v750_v54 = vpop.trf.xlu0 }
  0xcd   : > { %2559 = vmatmul.mubr.bf16.gmra.mrb[8].mxu0 %v750_v54  ;;  %v709_v54 = vld [vmem:[#allocation2 + $0x20] sm:$0xff] }
  0xd0   : > { %v751_v55 = vpop.trf.xlu0 }
  0xd1   : > { %2562 = vmatprep.mubr.bf16.mxu0 %v751_v55 }
  0xd4   : > { %v752_v56 = vpop.trf.xlu0 }
  0xd5   : > { %2563 = vmatmul.mubr.bf16.gmra.mrb[12].mxu0 %v752_v56  ;;  %v712_v56 = vld [vmem:[#allocation2 + $0x38] sm:$0xff] }
 0x144   : > { %v2584_v59 = vpop.f32.mrb[0].mxu1 }
 0x145   : > { %v1110_v61 = vadd.f32 %v2584_v59, %v933_v57  ;;  %v1045_v62 = vpop.f32.mrb[1].mxu1  ;;  %v710_v59 = vld [vmem:[#allocation2 + $0x28] sm:$0xff] }
 0x146   : > { %v1108_v0 = vadd.f32 %v1045_v62, %v931_v58  ;;  %v2585_v1 = vpop.f32.mrb[2].mxu1 }
 0x147   : > { %1126 = vst.msk [vmem:[#allocation3 + $0x10] sm:$0xff] %vm914_vm1, %v1110_v61  ;;  %v1111_v2 = vadd.f32 %v2585_v1, %v934_v60  ;;  %v1048_v3 = vpop.f32.mrb[3].mxu1  ;;  %v715_v1 = vld [vmem:[#allocation2 + $0x50] sm:$0xff] }
 0x148   : > { %1124 = vst.msk [vmem:[#allocation3] sm:$0xff] %vm914_vm1, %v1108_v0  ;;  %v1109_v4 = vadd.f32 %v1048_v3, %v932_v63 }
 0x149   : > { %1127 = vst.msk [vmem:[#allocation3 + $0x18] sm:$0xff] %vm914_vm1, %v1111_v2  ;;  %v713_v2 = vld [vmem:[#allocation2 + $0x40] sm:$0xff] }
 0x14a   : > { %1125 = vst.msk [vmem:[#allocation3 + $0x8] sm:$0xff] %vm914_vm1, %v1109_v4  ;;  %v716_v4 = vld [vmem:[#allocation2 + $0x58] sm:$0xff] }
 0x14c   : > { %v2588_v7 = vpop.f32.mrb[4].mxu1 }
 0x14d   : > { %v1114_v9 = vadd.f32 %v2588_v7, %v937_v5  ;;  %v1061_v10 = vpop.f32.mrb[5].mxu1  ;;  %v714_v7 = vld [vmem:[#allocation2 + $0x48] sm:$0xff] }
 0x14e   : > { %v1112_v12 = vadd.f32 %v1061_v10, %v935_v6  ;;  %v2589_v13 = vpop.f32.mrb[6].mxu1 }
 0x14f   : > { %1130 = vst.msk [vmem:[#allocation3 + $0x30] sm:$0xff] %vm914_vm1, %v1114_v9  ;;  %v1115_v14 = vadd.f32 %v2589_v13, %v938_v8  ;;  %v1064_v15 = vpop.f32.mrb[7].mxu1  ;;  %v719_v13 = vld [vmem:[#allocation2 + $0x70] sm:$0xff] }
 0x150   : > { %1128 = vst.msk [vmem:[#allocation3 + $0x20] sm:$0xff] %vm914_vm1, %v1112_v12  ;;  %v1113_v16 = vadd.f32 %v1064_v15, %v936_v11 }
 0x151   : > { %1131 = vst.msk [vmem:[#allocation3 + $0x38] sm:$0xff] %vm914_vm1, %v1115_v14  ;;  %v717_v14 = vld [vmem:[#allocation2 + $0x60] sm:$0xff] }
 0x152   : > { %1129 = vst.msk [vmem:[#allocation3 + $0x28] sm:$0xff] %vm914_vm1, %v1113_v16  ;;  %v720_v16 = vld [vmem:[#allocation2 + $0x78] sm:$0xff] }
 0x154   : > { %v2592_v19 = vpop.f32.mrb[8].mxu1 }
 0x155   : > { %v1118_v21 = vadd.f32 %v2592_v19, %v941_v17  ;;  %v1077_v22 = vpop.f32.mrb[9].mxu1  ;;  %v718_v19 = vld [vmem:[#allocation2 + $0x68] sm:$0xff] }
 0x156   : > { %v1116_v24 = vadd.f32 %v1077_v22, %v939_v18  ;;  %v2593_v25 = vpop.f32.mrb[10].mxu1 }
 0x157   : > { %1134 = vst.msk [vmem:[#allocation3 + $0x50] sm:$0xff] %vm914_vm1, %v1118_v21  ;;  %v1119_v26 = vadd.f32 %v2593_v25, %v942_v20  ;;  %v1080_v27 = vpop.f32.mrb[11].mxu1 }
 0x158   : > { %1132 = vst.msk [vmem:[#allocation3 + $0x40] sm:$0xff] %vm914_vm1, %v1116_v24  ;;  %v1117_v28 = vadd.f32 %v1080_v27, %v940_v23 }
 0x159   : > { %1135 = vst.msk [vmem:[#allocation3 + $0x58] sm:$0xff] %vm914_vm1, %v1119_v26 }
 0x15a   : > { %1133 = vst.msk [vmem:[#allocation3 + $0x48] sm:$0xff] %vm914_vm1, %v1117_v28 }
 0x15c   : > { %v2596_v31 = vpop.f32.mrb[12].mxu1 }
 0x15d   : > { %v1122_v33 = vadd.f32 %v2596_v31, %v945_v29  ;;  %v1093_v34 = vpop.f32.mrb[13].mxu1 }
 0x15e   : > { %v1120_v36 = vadd.f32 %v1093_v34, %v943_v30  ;;  %v2597_v37 = vpop.f32.mrb[14].mxu1 }
 0x15f   : > { %1138 = vst.msk [vmem:[#allocation3 + $0x70] sm:$0xff] %vm914_vm1, %v1122_v33  ;;  %v1123_v38 = vadd.f32 %v2597_v37, %v946_v32  ;;  %v1096_v39 = vpop.f32.mrb[15].mxu1 }
 0x160   : > { %1136 = vst.msk [vmem:[#allocation3 + $0x60] sm:$0xff] %vm914_vm1, %v1120_v36  ;;  %v1121_v40 = vadd.f32 %v1096_v39, %v944_v35 }
 0x161   : > { %1139 = vst.msk [vmem:[#allocation3 + $0x78] sm:$0xff] %vm914_vm1, %v1123_v38 }
 0x162   : > { %1137 = vst.msk [vmem:[#allocation3 + $0x68] sm:$0xff] %vm914_vm1, %v1121_v40 }
 0x190   : > { %v2552_v43 = vpop.f32.mrb[0].mxu0 }
 0x191   : > { %v900_v45 = vadd.f32 %v2552_v43, %v707_v41  ;;  %v835_v46 = vpop.f32.mrb[1].mxu0 }
 0x192   : > { %v898_v48 = vadd.f32 %v835_v46, %v705_v42  ;;  %v2553_v49 = vpop.f32.mrb[2].mxu0 }
 0x193   : > { %917 = vst.msk [vmem:[#allocation2 + $0x10] sm:$0xff] %vm914_vm1, %v900_v45  ;;  %v901_v50 = vadd.f32 %v2553_v49, %v708_v44  ;;  %v838_v51 = vpop.f32.mrb[3].mxu0 }
 0x194   : > { %915 = vst.msk [vmem:[#allocation2] sm:$0xff] %vm914_vm1, %v898_v48  ;;  %v899_v52 = vadd.f32 %v838_v51, %v706_v47 }
 0x195   : > { %918 = vst.msk [vmem:[#allocation2 + $0x18] sm:$0xff] %vm914_vm1, %v901_v50 }
 0x196   : > { %916 = vst.msk [vmem:[#allocation2 + $0x8] sm:$0xff] %vm914_vm1, %v899_v52 }
 0x198   : > { %v2556_v55 = vpop.f32.mrb[4].mxu0 }
 0x199   : > { %v904_v57 = vadd.f32 %v2556_v55, %v711_v53  ;;  %v851_v58 = vpop.f32.mrb[5].mxu0 }
 0x19a   : > { %v902_v60 = vadd.f32 %v851_v58, %v709_v54  ;;  %v2557_v61 = vpop.f32.mrb[6].mxu0 }
 0x19b   : > { %921 = vst.msk [vmem:[#allocation2 + $0x30] sm:$0xff] %vm914_vm1, %v904_v57  ;;  %v905_v62 = vadd.f32 %v2557_v61, %v712_v56  ;;  %v854_v63 = vpop.f32.mrb[7].mxu0 }
 0x19c   : > { %919 = vst.msk [vmem:[#allocation2 + $0x20] sm:$0xff] %vm914_vm1, %v902_v60  ;;  %v903_v0 = vadd.f32 %v854_v63, %v710_v59 }
 0x19d   : > { %922 = vst.msk [vmem:[#allocation2 + $0x38] sm:$0xff] %vm914_vm1, %v905_v62 }
 0x19e   : > { %920 = vst.msk [vmem:[#allocation2 + $0x28] sm:$0xff] %vm914_vm1, %v903_v0 }
 0x1a0   : > { %v2560_v3 = vpop.f32.mrb[8].mxu0 }
 0x1a1   : > { %v908_v5 = vadd.f32 %v2560_v3, %v715_v1  ;;  %v867_v6 = vpop.f32.mrb[9].mxu0 }
 0x1a2   : > { %v906_v8 = vadd.f32 %v867_v6, %v713_v2  ;;  %v2561_v9 = vpop.f32.mrb[10].mxu0 }
 0x1a3   : > { %925 = vst.msk [vmem:[#allocation2 + $0x50] sm:$0xff] %vm914_vm1, %v908_v5  ;;  %v909_v10 = vadd.f32 %v2561_v9, %v716_v4  ;;  %v870_v11 = vpop.f32.mrb[11].mxu0 }
 0x1a4   : > { %923 = vst.msk [vmem:[#allocation2 + $0x40] sm:$0xff] %vm914_vm1, %v906_v8  ;;  %v907_v12 = vadd.f32 %v870_v11, %v714_v7 }
 0x1a5   : > { %926 = vst.msk [vmem:[#allocation2 + $0x58] sm:$0xff] %vm914_vm1, %v909_v10 }
 0x1a6   : > { %924 = vst.msk [vmem:[#allocation2 + $0x48] sm:$0xff] %vm914_vm1, %v907_v12 }
 0x1a8   : > { %v2564_v15 = vpop.f32.mrb[12].mxu0  ;;  %1143 = sbr.rel (%p2425_p13) target bundleno = 965 (0x3c5), region = 140 }
 0x1a9   : > { %v912_v17 = vadd.f32 %v2564_v15, %v719_v13  ;;  %v883_v18 = vpop.f32.mrb[13].mxu0 }
 0x1aa   : > { %v910_v20 = vadd.f32 %v883_v18, %v717_v14  ;;  %v2565_v21 = vpop.f32.mrb[14].mxu0 }
 0x1ab   : > { %929 = vst.msk [vmem:[#allocation2 + $0x70] sm:$0xff] %vm914_vm1, %v912_v17  ;;  %v913_v22 = vadd.f32 %v2565_v21, %v720_v16  ;;  %v886_v23 = vpop.f32.mrb[15].mxu0 }
 0x1ac   : > { %927 = vst.msk [vmem:[#allocation2 + $0x60] sm:$0xff] %vm914_vm1, %v910_v20  ;;  %v911_v24 = vadd.f32 %v886_v23, %v718_v19 }
 0x1ad   : > { %930 = vst.msk [vmem:[#allocation2 + $0x78] sm:$0xff] %vm914_vm1, %v913_v22 }
 0x1ae   : > { %928 = vst.msk [vmem:[#allocation2 + $0x68] sm:$0xff] %vm914_vm1, %v911_v24 }
 0x1af   : > { %v1197_v25 = vld [vmem:[%s2971_s2 + $0x8] sm:$0xff]  ;;  %v1196_v26 = vld [vmem:[%s2971_s2] sm:$0xff]  ;;  %v2812_v27 = vmov 0   ;;  %v1696_v30 = vld [vmem:[%s2976_s30 + $0x10] sm:$0xff]  ;;  %s2813_s11 = smov 96   ;;  %vm1388_vm2 = vcmask 261120  }
 0x1b0   : > { %2754 = vset.pattern.permute.xlu1 %v2812_v27  ;;  %2753 = vset.pattern.permute.xlu0 %v2812_v27  ;;  %v1695_v28 = vld [vmem:[%s2976_s30 + $0x8] sm:$0xff]  ;;  %v1694_v29 = vld [vmem:[%s2976_s30] sm:$0xff]  ;;  %v1198_v31 = vld [vmem:[%s2971_s2 + $0x10] sm:$0xff] }
 0x1b1   : > { %1219 = vperm.xlu1 %2754, %v1197_v25   ;;  %1214 = vperm.xlu0 %2753, %v1196_v26   ;;  %v1697_v32 = vld [vmem:[%s2976_s30 + $0x18] sm:$0xff]  ;;  %v1698_v34 = vld [vmem:[%s2976_s30 + $0x20] sm:$0xff]  ;;  %v1699_v36 = vld [vmem:[%s2976_s30 + $0x28] sm:$0xff] }
 0x1b2   : > { %v1199_v33 = vld [vmem:[%s2971_s2 + $0x18] sm:$0xff]  ;;  %v1200_v35 = vld [vmem:[%s2971_s2 + $0x20] sm:$0xff]  ;;  %v1201_v37 = vld [vmem:[%s2971_s2 + $0x28] sm:$0xff] }
 0x1b3   : > { %v1700_v38 = vld [vmem:[%s2976_s30 + $0x30] sm:$0xff]  ;;  %v1701_v40 = vld [vmem:[%s2976_s30 + $0x38] sm:$0xff]  ;;  %v1702_v42 = vld [vmem:[%s2976_s30 + $0x40] sm:$0xff] }
 0x1b4   : > { %v1202_v39 = vld [vmem:[%s2971_s2 + $0x30] sm:$0xff]  ;;  %v1203_v41 = vld [vmem:[%s2971_s2 + $0x38] sm:$0xff]  ;;  %v1204_v43 = vld [vmem:[%s2971_s2 + $0x40] sm:$0xff] }
 0x1b5   : > { %1717 = vperm.xlu1 %2754, %v1695_v28   ;;  %1712 = vperm.xlu0 %2753, %v1694_v29   ;;  %v1703_v44 = vld [vmem:[%s2976_s30 + $0x48] sm:$0xff]  ;;  %v1704_v46 = vld [vmem:[%s2976_s30 + $0x50] sm:$0xff]  ;;  %v1705_v48 = vld [vmem:[%s2976_s30 + $0x58] sm:$0xff] }
 0x1b6   : > { %v1205_v45 = vld [vmem:[%s2971_s2 + $0x48] sm:$0xff]  ;;  %v1206_v47 = vld [vmem:[%s2971_s2 + $0x50] sm:$0xff]  ;;  %v1207_v49 = vld [vmem:[%s2971_s2 + $0x58] sm:$0xff] }
 0x1b7   : > { %v1706_v50 = vld [vmem:[%s2976_s30 + $0x60] sm:$0xff]  ;;  %v1707_v52 = vld [vmem:[%s2976_s30 + $0x68] sm:$0xff]  ;;  %v1708_v54 = vld [vmem:[%s2976_s30 + $0x70] sm:$0xff] }
 0x1b8   : > { %v1208_v51 = vld [vmem:[%s2971_s2 + $0x60] sm:$0xff]  ;;  %v1209_v53 = vld [vmem:[%s2971_s2 + $0x68] sm:$0xff]  ;;  %v1210_v55 = vld [vmem:[%s2971_s2 + $0x70] sm:$0xff] }
 0x1b9   : > { %1722 = vperm.xlu1 %2754, %v1696_v30   ;;  %1224 = vperm.xlu0 %2753, %v1198_v31   ;;  %v1709_v56 = vld [vmem:[%s2976_s30 + $0x78] sm:$0xff]  ;;  %v1144_v58 = vld [vmem:[%s3571_s8] sm:$0xff]  ;;  %v1145_v59 = vld [vmem:[%s3571_s8 + $0x8] sm:$0xff] }
 0x1ba   : > { %v1211_v57 = vld [vmem:[%s2971_s2 + $0x78] sm:$0xff]  ;;  %v2662_v60 = vpack.c.bf16 %v1145_v59, %v1144_v58  ;;  %v1146_v61 = vld [vmem:[%s3571_s8 + $0x10] sm:$0xff]  ;;  %v1180_v0 = vld [vmem:[#allocation2] sm:$0xff] }
 0x1bb   : > { %v1147_v62 = vld [vmem:[%s3571_s8 + $0x18] sm:$0xff]  ;;  %v1181_v2 = vld [vmem:[#allocation2 + $0x8] sm:$0xff]  ;;  %v1678_v5 = vld [vmem:[#allocation3] sm:$0xff] }
 0x1bc   : > { %2663 = vmatprep.subr.bf16.mxu0 %v2662_v60  ;;  %2671 = vmatprep.subr.bf16.mxu1 %v2662_v60  ;;  %v2666_v63 = vpack.c.bf16 %v1147_v62, %v1146_v61  ;;  %v1679_v10 = vld [vmem:[#allocation3 + $0x8] sm:$0xff]  ;;  %v1182_v11 = vld [vmem:[#allocation2 + $0x10] sm:$0xff]  ;;  %v1183_v17 = vld [vmem:[#allocation2 + $0x18] sm:$0xff] }
 0x1bd   : > { %1727 = vperm.xlu1 %2754, %v1697_v32   ;;  %1229 = vperm.xlu0 %2753, %v1199_v33   ;;  %v1680_v16 = vld [vmem:[#allocation3 + $0x10] sm:$0xff]  ;;  %v1681_v22 = vld [vmem:[#allocation3 + $0x18] sm:$0xff]  ;;  %v1184_v23 = vld [vmem:[#allocation2 + $0x20] sm:$0xff] }
 0x1be   : > { %2665 = vmatpush3.bf16.msra.mxu0 %v2662_v60  ;;  %2673 = vmatpush3.bf16.msra.mxu1 %v2662_v60  ;;  %v1682_v28 = vld [vmem:[#allocation3 + $0x20] sm:$0xff]  ;;  %v1185_v29 = vld [vmem:[#allocation2 + $0x28] sm:$0xff]  ;;  %v1190_v59 = vld [vmem:[#allocation2 + $0x50] sm:$0xff] }
 0x1bf   : > { %2667 = vmatprep.subr.bf16.mxu0 %v2666_v63  ;;  %2675 = vmatprep.subr.bf16.mxu1 %v2666_v63  ;;  %v1687_v58 = vld [vmem:[#allocation3 + $0x48] sm:$0xff] }
 0x1c1   : > { %1732 = vperm.xlu1 %2754, %v1698_v34   ;;  %1234 = vperm.xlu0 %2753, %v1200_v35   ;;  %v1683_v34 = vld [vmem:[#allocation3 + $0x28] sm:$0xff]  ;;  %v1186_v35 = vld [vmem:[#allocation2 + $0x30] sm:$0xff] }
 0x1c2   : > { %2669 = vmatpush3.bf16.msra.mxu0 %v2666_v63  ;;  %2677 = vmatpush3.bf16.msra.mxu1 %v2666_v63 }
 0x1c5   : > { %1737 = vperm.xlu1 %2754, %v1699_v36   ;;  %1239 = vperm.xlu0 %2753, %v1201_v37  }
 0x1c9   : > { %1742 = vperm.xlu1 %2754, %v1700_v38   ;;  %1244 = vperm.xlu0 %2753, %v1202_v39  }
 0x1cd   : > { %1747 = vperm.xlu1 %2754, %v1701_v40   ;;  %1249 = vperm.xlu0 %2753, %v1203_v41   ;;  %v1684_v40 = vld [vmem:[#allocation3 + $0x30] sm:$0xff]  ;;  %v1187_v41 = vld [vmem:[#allocation2 + $0x38] sm:$0xff] }
 0x1d1   : > { %1752 = vperm.xlu1 %2754, %v1702_v42   ;;  %1254 = vperm.xlu0 %2753, %v1204_v43  }
 0x1d5   : > { %1757 = vperm.xlu1 %2754, %v1703_v44   ;;  %1259 = vperm.xlu0 %2753, %v1205_v45  }
 0x1d9   : > { %1762 = vperm.xlu1 %2754, %v1704_v46   ;;  %1264 = vperm.xlu0 %2753, %v1206_v47   ;;  %v1685_v46 = vld [vmem:[#allocation3 + $0x38] sm:$0xff]  ;;  %v1188_v47 = vld [vmem:[#allocation2 + $0x40] sm:$0xff] }
 0x1dd   : > { %1767 = vperm.xlu1 %2754, %v1705_v48   ;;  %1269 = vperm.xlu0 %2753, %v1207_v49  }
 0x1e1   : > { %1772 = vperm.xlu1 %2754, %v1706_v50   ;;  %1274 = vperm.xlu0 %2753, %v1208_v51  }
 0x1e5   : > { %1777 = vperm.xlu1 %2754, %v1707_v52   ;;  %1279 = vperm.xlu0 %2753, %v1209_v53   ;;  %v1686_v52 = vld [vmem:[#allocation3 + $0x40] sm:$0xff]  ;;  %v1189_v53 = vld [vmem:[#allocation2 + $0x48] sm:$0xff] }
 0x1e9   : > { %1782 = vperm.xlu1 %2754, %v1708_v54   ;;  %1284 = vperm.xlu0 %2753, %v1210_v55  }
 0x1ed   : > { %1787 = vperm.xlu1 %2754, %v1709_v56   ;;  %1289 = vperm.xlu0 %2753, %v1211_v57  }
 0x230   : > { %v1220_v1 = vpop.permute.xlu1 %1219  ;;  %v1215_v3 = vpop.permute.xlu0 %1214 }
 0x231   : > { %v3126_v4 = vmul.f32 %v1215_v3, %v1180_v0  ;;  %v3128_v6 = vmul.f32 %v1220_v1, %v1181_v2  ;;  %v1688_v0 = vld [vmem:[#allocation3 + $0x50] sm:$0xff]  ;;  %v1191_v1 = vld [vmem:[#allocation2 + $0x58] sm:$0xff] }
 0x233   : > { %1324 = vrot.lane.b32.xlu0 %v3126_v4, %s2813_s11 }
 0x234   : > { %v1718_v7 = vpop.permute.xlu1 %1717  ;;  %v1713_v8 = vpop.permute.xlu0 %1712 }
 0x235   : > { %v3132_v9 = vmul.f32 %v1713_v8, %v1678_v5  ;;  %v3138_v14 = vmul.f32 %v1718_v7, %v1679_v10  ;;  %v1689_v8 = vld [vmem:[#allocation3 + $0x58] sm:$0xff]  ;;  %v1192_v10 = vld [vmem:[#allocation2 + $0x60] sm:$0xff] }
 0x237   : > { %1822 = vrot.lane.b32.xlu1 %v3132_v9, %s2813_s11  ;;  %1326 = vrot.lane.b32.xlu0 %v3128_v6, %s2813_s11 }
 0x238   : > { %v1723_v12 = vpop.permute.xlu1 %1722  ;;  %v1225_v13 = vpop.permute.xlu0 %1224 }
 0x239   : > { %v3140_v15 = vmul.f32 %v1225_v13, %v1182_v11  ;;  %v3146_v20 = vmul.f32 %v1723_v12, %v1680_v16 }
 0x23b   : > { %1824 = vrot.lane.b32.xlu1 %v3138_v14, %s2813_s11  ;;  %1328 = vrot.lane.b32.xlu0 %v3140_v15, %s2813_s11 }
 0x23c   : > { %v1728_v18 = vpop.permute.xlu1 %1727  ;;  %v1230_v19 = vpop.permute.xlu0 %1229 }
 0x23d   : > { %v3148_v21 = vmul.f32 %v1230_v19, %v1183_v17  ;;  %v3154_v26 = vmul.f32 %v1728_v18, %v1681_v22  ;;  %v1690_v17 = vld [vmem:[#allocation3 + $0x60] sm:$0xff]  ;;  %v1193_v18 = vld [vmem:[#allocation2 + $0x68] sm:$0xff] }
 0x23f   : > { %1826 = vrot.lane.b32.xlu1 %v3146_v20, %s2813_s11  ;;  %1330 = vrot.lane.b32.xlu0 %v3148_v21, %s2813_s11 }
 0x240   : > { %v1733_v24 = vpop.permute.xlu1 %1732  ;;  %v1235_v25 = vpop.permute.xlu0 %1234 }
 0x241   : > { %v3156_v27 = vmul.f32 %v1235_v25, %v1184_v23  ;;  %v3162_v32 = vmul.f32 %v1733_v24, %v1682_v28  ;;  %v1691_v25 = vld [vmem:[#allocation3 + $0x68] sm:$0xff]  ;;  %v1194_v28 = vld [vmem:[#allocation2 + $0x70] sm:$0xff] }
 0x243   : > { %1828 = vrot.lane.b32.xlu1 %v3154_v26, %s2813_s11  ;;  %1332 = vrot.lane.b32.xlu0 %v3156_v27, %s2813_s11 }
 0x244   : > { %v1738_v30 = vpop.permute.xlu1 %1737  ;;  %v1240_v31 = vpop.permute.xlu0 %1239 }
 0x245   : > { %v3164_v33 = vmul.f32 %v1240_v31, %v1185_v29  ;;  %v3170_v38 = vmul.f32 %v1738_v30, %v1683_v34 }
 0x247   : > { %1830 = vrot.lane.b32.xlu1 %v3162_v32, %s2813_s11  ;;  %1334 = vrot.lane.b32.xlu0 %v3164_v33, %s2813_s11 }
 0x248   : > { %v1743_v36 = vpop.permute.xlu1 %1742  ;;  %v1245_v37 = vpop.permute.xlu0 %1244 }
 0x249   : > { %v3172_v39 = vmul.f32 %v1245_v37, %v1186_v35  ;;  %v3178_v44 = vmul.f32 %v1743_v36, %v1684_v40  ;;  %v1692_v35 = vld [vmem:[#allocation3 + $0x70] sm:$0xff]  ;;  %v1195_v36 = vld [vmem:[#allocation2 + $0x78] sm:$0xff] }
 0x24b   : > { %1832 = vrot.lane.b32.xlu1 %v3170_v38, %s2813_s11  ;;  %1336 = vrot.lane.b32.xlu0 %v3172_v39, %s2813_s11 }
 0x24c   : > { %v1748_v42 = vpop.permute.xlu1 %1747  ;;  %v1250_v43 = vpop.permute.xlu0 %1249 }
 0x24d   : > { %v3180_v45 = vmul.f32 %v1250_v43, %v1187_v41  ;;  %v3186_v50 = vmul.f32 %v1748_v42, %v1685_v46  ;;  %v1693_v42 = vld [vmem:[#allocation3 + $0x78] sm:$0xff] }
 0x24f   : > { %1834 = vrot.lane.b32.xlu1 %v3178_v44, %s2813_s11  ;;  %1338 = vrot.lane.b32.xlu0 %v3180_v45, %s2813_s11 }
 0x250   : > { %v1753_v48 = vpop.permute.xlu1 %1752  ;;  %v1255_v49 = vpop.permute.xlu0 %1254 }
 0x251   : > { %v3188_v51 = vmul.f32 %v1255_v49, %v1188_v47  ;;  %v3194_v56 = vmul.f32 %v1753_v48, %v1686_v52  ;;  %v3255_v47 = vld [vmem:[%s2966_s20] sm:$0xff] }
 0x252   : > { %v3259_v52 = vld [vmem:[%s2961_s22] sm:$0xff] }
 0x253   : > { %1836 = vrot.lane.b32.xlu1 %v3186_v50, %s2813_s11  ;;  %1340 = vrot.lane.b32.xlu0 %v3188_v51, %s2813_s11 }
 0x254   : > { %v1758_v54 = vpop.permute.xlu1 %1757  ;;  %v1260_v55 = vpop.permute.xlu0 %1259 }
 0x255   : > { %v3196_v57 = vmul.f32 %v1260_v55, %v1189_v53  ;;  %v3202_v62 = vmul.f32 %v1758_v54, %v1687_v58  ;;  %v3262_v53 = vld [vmem:[%s2966_s20 + $0x8] sm:$0xff] }
 0x257   : > { %1838 = vrot.lane.b32.xlu1 %v3194_v56, %s2813_s11  ;;  %1342 = vrot.lane.b32.xlu0 %v3196_v57, %s2813_s11 }
 0x258   : > { %v1763_v60 = vpop.permute.xlu1 %1762  ;;  %v1265_v61 = vpop.permute.xlu0 %1264 }
 0x259   : > { %v3204_v63 = vmul.f32 %v1265_v61, %v1190_v59  ;;  %v3210_v5 = vmul.f32 %v1763_v60, %v1688_v0  ;;  %v3268_v60 = vld [vmem:[%s2961_s22 + $0x8] sm:$0xff]  ;;  %v3271_v61 = vld [vmem:[%s2966_s20 + $0x10] sm:$0xff] }
 0x25b   : > { %1840 = vrot.lane.b32.xlu1 %v3202_v62, %s2813_s11  ;;  %1344 = vrot.lane.b32.xlu0 %v3204_v63, %s2813_s11 }
 0x25c   : > { %v1768_v2 = vpop.permute.xlu1 %1767  ;;  %v1270_v3 = vpop.permute.xlu0 %1269 }
 0x25d   : > { %v3212_v7 = vmul.f32 %v1270_v3, %v1191_v1  ;;  %v3218_v13 = vmul.f32 %v1768_v2, %v1689_v8  ;;  %v3278_v8 = vld [vmem:[%s2961_s22 + $0x10] sm:$0xff] }
 0x25f   : > { %1842 = vrot.lane.b32.xlu1 %v3210_v5, %s2813_s11  ;;  %1346 = vrot.lane.b32.xlu0 %v3212_v7, %s2813_s11 }
 0x260   : > { %v1773_v11 = vpop.permute.xlu1 %1772  ;;  %v1275_v12 = vpop.permute.xlu0 %1274 }
 0x261   : > { %v3220_v16 = vmul.f32 %v1275_v12, %v1192_v10  ;;  %v3226_v23 = vmul.f32 %v1773_v11, %v1690_v17  ;;  %v3281_v10 = vld [vmem:[%s2966_s20 + $0x18] sm:$0xff] }
 0x263   : > { %1844 = vrot.lane.b32.xlu1 %v3218_v13, %s2813_s11  ;;  %1348 = vrot.lane.b32.xlu0 %v3220_v16, %s2813_s11  ;;  %3602 = vst [vmem:[#allocation8_spill] sm:$0xff] %v3226_v23 }
 0x264   : > { %v1778_v19 = vpop.permute.xlu1 %1777  ;;  %v1280_v22 = vpop.permute.xlu0 %1279 }
 0x265   : > { %v3228_v24 = vmul.f32 %v1280_v22, %v1193_v18  ;;  %v3234_v31 = vmul.f32 %v1778_v19, %v1691_v25  ;;  %v3288_v19 = vld [vmem:[%s2961_s22 + $0x18] sm:$0xff]  ;;  %v3291_v22 = vld [vmem:[%s2966_s20 + $0x20] sm:$0xff] }
 0x267   : > { %1846 = vrot.lane.b32.xlu1 %v3226_v23, %s2813_s11  ;;  %1350 = vrot.lane.b32.xlu0 %v3228_v24, %s2813_s11  ;;  %3603 = vst [vmem:[#allocation9_spill] sm:$0xff] %v3234_v31  ;;  %v3398_v23 = vld [vmem:[%s2961_s22 + $0x70] sm:$0xff] }
 0x268   : > { %v1783_v29 = vpop.permute.xlu1 %1782  ;;  %v1285_v30 = vpop.permute.xlu0 %1284  ;;  %3612 = vst [vmem:[#allocation18_spill] sm:$0xff] %v3398_v23 }
 0x269   : > { %v3236_v34 = vmul.f32 %v1285_v30, %v1194_v28  ;;  %v3242_v40 = vmul.f32 %v1783_v29, %v1692_v35  ;;  %v3298_v35 = vld [vmem:[%s2961_s22 + $0x20] sm:$0xff] }
 0x26b   : > { %3604 = vst [vmem:[#allocation10_spill] sm:$0xff] %v3236_v34  ;;  %1848 = vrot.lane.b32.xlu1 %v3234_v31, %s2813_s11  ;;  %1352 = vrot.lane.b32.xlu0 %v3236_v34, %s2813_s11  ;;  %3605 = vst [vmem:[#allocation11_spill] sm:$0xff] %v3242_v40  ;;  %v3408_v31 = vld [vmem:[%s2961_s22 + $0x78] sm:$0xff] }
 0x26c   : > { %v1290_v37 = vpop.permute.xlu0 %1289  ;;  %v1788_v43 = vpop.permute.xlu1 %1787  ;;  %3614 = vst [vmem:[#allocation20_spill] sm:$0xff] %v3408_v31 }
 0x26d   : > { %v3244_v41 = vmul.f32 %v1290_v37, %v1195_v36  ;;  %v3250_v46 = vmul.f32 %v1788_v43, %v1693_v42  ;;  %v3301_v36 = vld [vmem:[%s2966_s20 + $0x28] sm:$0xff] }
 0x26f   : > { %3606 = vst [vmem:[#allocation12_spill] sm:$0xff] %v3244_v41  ;;  %1850 = vrot.lane.b32.xlu1 %v3242_v40, %s2813_s11  ;;  %1354 = vrot.lane.b32.xlu0 %v3244_v41, %s2813_s11  ;;  %3607 = vst [vmem:[#allocation13_spill] sm:$0xff] %v3250_v46  ;;  %v3388_v41 = vld [vmem:[%s2961_s22 + $0x68] sm:$0xff] }
 0x273   : > { %1852 = vrot.lane.b32.xlu1 %v3250_v46, %s2813_s11  ;;  %v3378_v46 = vld [vmem:[%s2961_s22 + $0x60] sm:$0xff] }
 0x274   : > { %3609 = vst [vmem:[#allocation15_spill] sm:$0xff] %v3378_v46 }
 0x2a5   : > { %v1325_v48 = vpop.permute.xlu0 %1324 }
 0x2a6   : > { %v1372_v49 = vmul.f32 %v1325_v48, %v3255_v47 }
 0x2a8   : > { %2606 = vmatprep.mubr.msk.f32.mxu0 %vm1388_vm2, %v1372_v49  ;;  %v3308_v49 = vld [vmem:[%s2961_s22 + $0x28] sm:$0xff] }
 0x2a9   : > { %v1823_v54 = vpop.permute.xlu1 %1822  ;;  %v1327_v55 = vpop.permute.xlu0 %1326 }
 0x2aa   : > { %v1870_v58 = vmul.f32 %v1823_v54, %v3259_v52  ;;  %v1373_v59 = vmul.f32 %v1327_v55, %v3262_v53  ;;  %v3311_v54 = vld [vmem:[%s2966_s20 + $0x30] sm:$0xff] }
 0x2ac   : > { %2607 = vmatmul.mubr.msk.f32.vlgmr.msra.gmra.mrb[0].mxu0 %vm1388_vm2, %v1373_v59  ;;  %2638 = vmatprep.mubr.msk.f32.mxu1 %vm1388_vm2, %v1870_v58 }
 0x2ad   : > { %v1825_v0 = vpop.permute.xlu1 %1824  ;;  %v1329_v1 = vpop.permute.xlu0 %1328 }
 0x2ae   : > { %v1871_v2 = vmul.f32 %v1825_v0, %v3268_v60  ;;  %v1374_v3 = vmul.f32 %v1329_v1, %v3271_v61  ;;  %v3318_v1 = vld [vmem:[%s2961_s22 + $0x30] sm:$0xff] }
 0x2b0   : > { %2609 = vmatprep.mubr.msk.f32.mxu0 %vm1388_vm2, %v1374_v3  ;;  %2639 = vmatmul.mubr.msk.f32.vlgmr.msra.gmra.mrb[0].mxu1 %vm1388_vm2, %v1871_v2  ;;  %v3321_v2 = vld [vmem:[%s2966_s20 + $0x38] sm:$0xff] }
 0x2b1   : > { %v1827_v11 = vpop.permute.xlu1 %1826  ;;  %v1331_v12 = vpop.permute.xlu0 %1330 }
 0x2b2   : > { %v1872_v17 = vmul.f32 %v1827_v11, %v3278_v8  ;;  %v1375_v18 = vmul.f32 %v1331_v12, %v3281_v10 }
 0x2b4   : > { %2610 = vmatmul.mubr.msk.f32.gmra.mrb[2].mxu0 %vm1388_vm2, %v1375_v18  ;;  %2641 = vmatprep.mubr.msk.f32.mxu1 %vm1388_vm2, %v1872_v17  ;;  %v3328_v18 = vld [vmem:[%s2961_s22 + $0x38] sm:$0xff] }
 0x2b5   : > { %v1829_v25 = vpop.permute.xlu1 %1828  ;;  %v1333_v28 = vpop.permute.xlu0 %1332 }
 0x2b6   : > { %v1873_v29 = vmul.f32 %v1829_v25, %v3288_v19  ;;  %v1376_v30 = vmul.f32 %v1333_v28, %v3291_v22  ;;  %v3331_v25 = vld [vmem:[%s2966_s20 + $0x40] sm:$0xff] }
 0x2b8   : > { %2612 = vmatprep.mubr.msk.f32.mxu0 %vm1388_vm2, %v1376_v30  ;;  %2642 = vmatmul.mubr.msk.f32.gmra.mrb[2].mxu1 %vm1388_vm2, %v1873_v29 }
 0x2b9   : > { %v1831_v37 = vpop.permute.xlu1 %1830  ;;  %v1335_v42 = vpop.permute.xlu0 %1334 }
 0x2ba   : > { %v1874_v43 = vmul.f32 %v1831_v37, %v3298_v35  ;;  %v1377_v48 = vmul.f32 %v1335_v42, %v3301_v36  ;;  %v3338_v42 = vld [vmem:[%s2961_s22 + $0x40] sm:$0xff] }
 0x2bc   : > { %2613 = vmatmul.mubr.msk.f32.gmra.mrb[4].mxu0 %vm1388_vm2, %v1377_v48  ;;  %2644 = vmatprep.mubr.msk.f32.mxu1 %vm1388_vm2, %v1874_v43  ;;  %v3341_v43 = vld [vmem:[%s2966_s20 + $0x48] sm:$0xff] }
 0x2bd   : > { %v1833_v55 = vpop.permute.xlu1 %1832  ;;  %v1337_v58 = vpop.permute.xlu0 %1336 }
 0x2be   : > { %v1875_v59 = vmul.f32 %v1833_v55, %v3308_v49  ;;  %v1378_v0 = vmul.f32 %v1337_v58, %v3311_v54 }
 0x2c0   : > { %2615 = vmatprep.mubr.msk.f32.mxu0 %vm1388_vm2, %v1378_v0  ;;  %2645 = vmatmul.mubr.msk.f32.gmra.mrb[4].mxu1 %vm1388_vm2, %v1875_v59  ;;  %v3348_v0 = vld [vmem:[%s2961_s22 + $0x48] sm:$0xff] }
 0x2c1   : > { %v1835_v3 = vpop.permute.xlu1 %1834  ;;  %v1339_v11 = vpop.permute.xlu0 %1338 }
 0x2c2   : > { %v1876_v12 = vmul.f32 %v1835_v3, %v3318_v1  ;;  %v1379_v17 = vmul.f32 %v1339_v11, %v3321_v2  ;;  %v3351_v3 = vld [vmem:[%s2966_s20 + $0x50] sm:$0xff] }
 0x2c4   : > { %2616 = vmatmul.mubr.msk.f32.gmra.mrb[6].mxu0 %vm1388_vm2, %v1379_v17  ;;  %2647 = vmatprep.mubr.msk.f32.mxu1 %vm1388_vm2, %v1876_v12 }
 0x2c5   : > { %v1837_v28 = vpop.permute.xlu1 %1836  ;;  %v1341_v29 = vpop.permute.xlu0 %1340 }
 0x2c6   : > { %v1877_v30 = vmul.f32 %v1837_v28, %v3328_v18  ;;  %v1380_v37 = vmul.f32 %v1341_v29, %v3331_v25  ;;  %v3358_v29 = vld [vmem:[%s2961_s22 + $0x50] sm:$0xff] }
 0x2c8   : > { %2618 = vmatprep.mubr.msk.f32.mxu0 %vm1388_vm2, %v1380_v37  ;;  %2648 = vmatmul.mubr.msk.f32.gmra.mrb[6].mxu1 %vm1388_vm2, %v1877_v30  ;;  %v3361_v30 = vld [vmem:[%s2966_s20 + $0x58] sm:$0xff] }
 0x2c9   : > { %v1839_v48 = vpop.permute.xlu1 %1838  ;;  %v1343_v55 = vpop.permute.xlu0 %1342 }
 0x2ca   : > { %v1878_v58 = vmul.f32 %v1839_v48, %v3338_v42  ;;  %v1381_v59 = vmul.f32 %v1343_v55, %v3341_v43 }
 0x2cc   : > { %2619 = vmatmul.mubr.msk.f32.gmra.mrb[8].mxu0 %vm1388_vm2, %v1381_v59  ;;  %2650 = vmatprep.mubr.msk.f32.mxu1 %vm1388_vm2, %v1878_v58  ;;  %v3368_v59 = vld [vmem:[%s2961_s22 + $0x58] sm:$0xff] }
 0x2cd   : > { %v1841_v11 = vpop.permute.xlu1 %1840  ;;  %v1345_v12 = vpop.permute.xlu0 %1344 }
 0x2ce   : > { %v1879_v17 = vmul.f32 %v1841_v11, %v3348_v0  ;;  %v1382_v28 = vmul.f32 %v1345_v12, %v3351_v3  ;;  %v3371_v11 = vld [vmem:[%s2966_s20 + $0x60] sm:$0xff] }
 0x2cf   : > { %3608 = vst [vmem:[#allocation14_spill] sm:$0xff] %v3371_v11 }
 0x2d0   : > { %2621 = vmatprep.mubr.msk.f32.mxu0 %vm1388_vm2, %v1382_v28  ;;  %2651 = vmatmul.mubr.msk.f32.gmra.mrb[8].mxu1 %vm1388_vm2, %v1879_v17 }
 0x2d1   : > { %v1843_v37 = vpop.permute.xlu1 %1842  ;;  %v1347_v48 = vpop.permute.xlu0 %1346 }
 0x2d2   : > { %v1880_v55 = vmul.f32 %v1843_v37, %v3358_v29  ;;  %v1383_v58 = vmul.f32 %v1347_v48, %v3361_v30  ;;  %v3381_v37 = vld [vmem:[%s2966_s20 + $0x68] sm:$0xff] }
 0x2d3   : > { %3610 = vst [vmem:[#allocation16_spill] sm:$0xff] %v3381_v37 }
 0x2d4   : > { %2622 = vmatmul.mubr.msk.f32.gmra.mrb[10].mxu0 %vm1388_vm2, %v1383_v58  ;;  %2653 = vmatprep.mubr.msk.f32.mxu1 %vm1388_vm2, %v1880_v55 }
 0x2d5   : > { %v1845_v12 = vpop.permute.xlu1 %1844  ;;  %v1349_v28 = vpop.permute.xlu0 %1348 }
 0x2d6   : > { %v1881_v17 = vmul.f32 %v1845_v12, %v3368_v59  ;;  %v1384_v40 = vmul.f32 %v1349_v28, %v3371_v11  ;;  %v3391_v12 = vld [vmem:[%s2966_s20 + $0x70] sm:$0xff] }
 0x2d7   : > { %3611 = vst [vmem:[#allocation17_spill] sm:$0xff] %v3391_v12 }
 0x2d8   : > { %2624 = vmatprep.mubr.msk.f32.mxu0 %vm1388_vm2, %v1384_v40  ;;  %2654 = vmatmul.mubr.msk.f32.gmra.mrb[10].mxu1 %vm1388_vm2, %v1881_v17 }
 0x2d9   : > { %v1847_v48 = vpop.permute.xlu1 %1846  ;;  %v1351_v58 = vpop.permute.xlu0 %1350 }
 0x2da   : > { %v1882_v55 = vmul.f32 %v1847_v48, %v3378_v46  ;;  %v1385_v34 = vmul.f32 %v1351_v58, %v3381_v37  ;;  %v3401_v48 = vld [vmem:[%s2966_s20 + $0x78] sm:$0xff] }
 0x2db   : > { %3613 = vst [vmem:[#allocation19_spill] sm:$0xff] %v3401_v48 }
 0x2dc   : > { %2625 = vmatmul.mubr.msk.f32.gmra.mrb[12].mxu0 %vm1388_vm2, %v1385_v34  ;;  %2656 = vmatprep.mubr.msk.f32.mxu1 %vm1388_vm2, %v1882_v55 }
 0x2dd   : > { %v1849_v28 = vpop.permute.xlu1 %1848  ;;  %v1353_v11 = vpop.permute.xlu0 %1352 }
 0x2de   : > { %v1883_v40 = vmul.f32 %v1849_v28, %v3388_v41  ;;  %v1386_v17 = vmul.f32 %v1353_v11, %v3391_v12 }
 0x2e0   : > { %2627 = vmatprep.mubr.msk.f32.mxu0 %vm1388_vm2, %v1386_v17  ;;  %2657 = vmatmul.mubr.msk.f32.gmra.mrb[12].mxu1 %vm1388_vm2, %v1883_v40 }
 0x2e1   : > { %v1851_v58 = vpop.permute.xlu1 %1850  ;;  %v1355_v37 = vpop.permute.xlu0 %1354 }
 0x2e2   : > { %v1884_v34 = vmul.f32 %v1851_v58, %v3398_v23  ;;  %v1387_v55 = vmul.f32 %v1355_v37, %v3401_v48 }
 0x2e4   : > { %2628 = vmatmul.mubr.msk.f32.gmra.mrb[14].mxu0 %vm1388_vm2, %v1387_v55  ;;  %2659 = vmatprep.mubr.msk.f32.mxu1 %vm1388_vm2, %v1884_v34 }
 0x2e5   : > { %v1853_v11 = vpop.permute.xlu1 %1852 }
 0x2e6   : > { %v1885_v28 = vmul.f32 %v1853_v11, %v3408_v31 }
 0x2e8   : > { %2660 = vmatmul.mubr.msk.f32.gmra.mrb[14].mxu1 %vm1388_vm2, %v1885_v28 }
 0x37f   : > { %v2608_v17 = vpop.f32.mrb[0].mxu0 }
 0x380   : > { %v1583_v40 = vadd.f32 %v2608_v17, %v3128_v6  ;;  %v1503_v12 = vpop.f32.mrb[1].mxu0 }
 0x381   : > { %v1582_v58 = vadd.f32 %v1503_v12, %v3126_v4 }
 0x382   : > { %v1599_v37 = vadd.f32 %v1583_v40, %v3268_v60 }
 0x383   : > { %v1598_v48 = vadd.f32 %v1582_v58, %v3259_v52  ;;  %v2640_v55 = vpop.f32.mrb[0].mxu1 }
 0x384   : > { %vm1615_vm3 = vcmp.ge.f32.partialorder %v1599_v37, 0.0  ;;  %v1631_v34 = vmul.f32 0.2, %v1599_v37  ;;  %v2080_v23 = vadd.f32 %v2640_v55, %v3138_v14  ;;  %v2000_v11 = vpop.f32.mrb[1].mxu1 }
 0x385   : > { %vm1614_vm4 = vcmp.ge.f32.partialorder %v1598_v48, 0.0  ;;  %v1630_v28 = vmul.f32 0.2, %v1598_v48  ;;  %v2079_v31 = vadd.f32 %v2000_v11, %v3132_v9 }
 0x386   : > { %v1647_v46 = vsel %vm1615_vm3, %v1599_v37, %v1631_v34  ;;  %v2096_v6 = vadd.f32 %v2080_v23, %v3262_v53 }
 0x387   : > { %1663 = vst.msk [vmem:[%s2981_s1 + $0x8] sm:$0xff] %vm1388_vm2, %v1647_v46  ;;  %v1646_v4 = vsel %vm1614_vm4, %v1598_v48, %v1630_v28  ;;  %v2095_v60 = vadd.f32 %v2079_v31, %v3255_v47  ;;  %v2611_v52 = vpop.f32.mrb[2].mxu0 }
 0x388   : > { %1662 = vst.msk [vmem:[%s2981_s1] sm:$0xff] %vm1388_vm2, %v1646_v4  ;;  %vm2112_vm5 = vcmp.ge.f32.partialorder %v2096_v6, 0.0  ;;  %v2128_v14 = vmul.f32 0.2, %v2096_v6  ;;  %v1585_v12 = vadd.f32 %v2611_v52, %v3148_v21  ;;  %v1513_v17 = vpop.f32.mrb[3].mxu0 }
 0x389   : > { %vm2111_vm6 = vcmp.ge.f32.partialorder %v2095_v60, 0.0  ;;  %v2127_v9 = vmul.f32 0.2, %v2095_v60  ;;  %v1584_v40 = vadd.f32 %v1513_v17, %v3140_v15 }
 0x38a   : > { %v2144_v58 = vsel %vm2112_vm5, %v2096_v6, %v2128_v14  ;;  %v1601_v23 = vadd.f32 %v1585_v12, %v3288_v19 }
 0x38b   : > { %2160 = vst.msk [vmem:[%s2986_s16 + $0x8] sm:$0xff] %vm1388_vm2, %v2144_v58  ;;  %v2143_v31 = vsel %vm2111_vm6, %v2095_v60, %v2127_v9  ;;  %v1600_v46 = vadd.f32 %v1584_v40, %v3278_v8  ;;  %v2643_v47 = vpop.f32.mrb[2].mxu1 }
 0x38c   : > { %2159 = vst.msk [vmem:[%s2986_s16] sm:$0xff] %vm1388_vm2, %v2143_v31  ;;  %vm1617_vm7 = vcmp.ge.f32.partialorder %v1601_v23, 0.0  ;;  %v1633_v21 = vmul.f32 0.2, %v1601_v23  ;;  %v2082_v53 = vadd.f32 %v2643_v47, %v3154_v26  ;;  %v2010_v48 = vpop.f32.mrb[3].mxu1 }
 0x38d   : > { %vm1616_vm8 = vcmp.ge.f32.partialorder %v1600_v46, 0.0  ;;  %v1632_v15 = vmul.f32 0.2, %v1600_v46  ;;  %v2081_v37 = vadd.f32 %v2010_v48, %v3146_v20 }
 0x38e   : > { %v1649_v55 = vsel %vm1617_vm7, %v1601_v23, %v1633_v21  ;;  %v2098_v19 = vadd.f32 %v2082_v53, %v3281_v10 }
 0x38f   : > { %1665 = vst.msk [vmem:[%s2981_s1 + $0x18] sm:$0xff] %vm1388_vm2, %v1649_v55  ;;  %v1648_v8 = vsel %vm1616_vm8, %v1600_v46, %v1632_v15  ;;  %v2097_v34 = vadd.f32 %v2081_v37, %v3271_v61  ;;  %v2614_v11 = vpop.f32.mrb[4].mxu0 }
 0x390   : > { %1664 = vst.msk [vmem:[%s2981_s1 + $0x10] sm:$0xff] %vm1388_vm2, %v1648_v8  ;;  %vm2114_vm9 = vcmp.ge.f32.partialorder %v2098_v19, 0.0  ;;  %v2130_v26 = vmul.f32 0.2, %v2098_v19  ;;  %v1587_v28 = vadd.f32 %v2614_v11, %v3164_v33  ;;  %v1523_v6 = vpop.f32.mrb[5].mxu0 }
 0x391   : > { %vm2113_vm10 = vcmp.ge.f32.partialorder %v2097_v34, 0.0  ;;  %v2129_v20 = vmul.f32 0.2, %v2097_v34  ;;  %v1586_v4 = vadd.f32 %v1523_v6, %v3156_v27 }
 0x392   : > { %v2146_v60 = vsel %vm2114_vm9, %v2098_v19, %v2130_v26  ;;  %v1603_v10 = vadd.f32 %v1587_v28, %v3308_v49 }
 0x393   : > { %2162 = vst.msk [vmem:[%s2986_s16 + $0x18] sm:$0xff] %vm1388_vm2, %v2146_v60  ;;  %v2145_v61 = vsel %vm2113_vm10, %v2097_v34, %v2129_v20  ;;  %v1602_v52 = vadd.f32 %v1586_v4, %v3298_v35  ;;  %v2646_v14 = vpop.f32.mrb[4].mxu1 }
 0x394   : > { %2161 = vst.msk [vmem:[%s2986_s16 + $0x10] sm:$0xff] %vm1388_vm2, %v2145_v61  ;;  %vm1619_vm11 = vcmp.ge.f32.partialorder %v1603_v10, 0.0  ;;  %v1635_v33 = vmul.f32 0.2, %v1603_v10  ;;  %v2084_v12 = vadd.f32 %v2646_v14, %v3170_v38  ;;  %v2020_v17 = vpop.f32.mrb[5].mxu1 }
 0x395   : > { %vm1618_vm12 = vcmp.ge.f32.partialorder %v1602_v52, 0.0  ;;  %v1634_v27 = vmul.f32 0.2, %v1602_v52  ;;  %v2083_v9 = vadd.f32 %v2020_v17, %v3162_v32 }
 0x396   : > { %v1651_v40 = vsel %vm1619_vm11, %v1603_v10, %v1635_v33  ;;  %v2100_v49 = vadd.f32 %v2084_v12, %v3301_v36 }
 0x397   : > { %1667 = vst.msk [vmem:[%s2981_s1 + $0x28] sm:$0xff] %vm1388_vm2, %v1651_v40  ;;  %v1650_v35 = vsel %vm1618_vm12, %v1602_v52, %v1634_v27  ;;  %v2099_v58 = vadd.f32 %v2083_v9, %v3291_v22  ;;  %v2617_v23 = vpop.f32.mrb[6].mxu0 }
 0x398   : > { %1666 = vst.msk [vmem:[%s2981_s1 + $0x20] sm:$0xff] %vm1388_vm2, %v1650_v35  ;;  %vm2116_vm13 = vcmp.ge.f32.partialorder %v2100_v49, 0.0  ;;  %v2132_v38 = vmul.f32 0.2, %v2100_v49  ;;  %v1589_v31 = vadd.f32 %v2617_v23, %v3180_v45  ;;  %v1533_v46 = vpop.f32.mrb[7].mxu0 }
 0x399   : > { %vm2115_vm14 = vcmp.ge.f32.partialorder %v2099_v58, 0.0  ;;  %v2131_v32 = vmul.f32 0.2, %v2099_v58  ;;  %v1588_v47 = vadd.f32 %v1533_v46, %v3172_v39 }
 0x39a   : > { %v2148_v21 = vsel %vm2116_vm13, %v2100_v49, %v2132_v38  ;;  %v1605_v36 = vadd.f32 %v1589_v31, %v3328_v18 }
 0x39b   : > { %2164 = vst.msk [vmem:[%s2986_s16 + $0x28] sm:$0xff] %vm1388_vm2, %v2148_v21  ;;  %v2147_v22 = vsel %vm2115_vm14, %v2099_v58, %v2131_v32  ;;  %v1604_v53 = vadd.f32 %v1588_v47, %v3318_v1  ;;  %v2649_v48 = vpop.f32.mrb[6].mxu1 }
 0x39c   : > { %2163 = vst.msk [vmem:[%s2986_s16 + $0x20] sm:$0xff] %vm1388_vm2, %v2147_v22  ;;  %vm1621_vm15 = vcmp.ge.f32.partialorder %v1605_v36, 0.0  ;;  %v1637_v45 = vmul.f32 0.2, %v1605_v36  ;;  %v2086_v15 = vadd.f32 %v2649_v48, %v3186_v50  ;;  %v2030_v37 = vpop.f32.mrb[7].mxu1  ;;  %v3615_v22 = vld [vmem:[#allocation15_spill] sm:$0xff] }
 0x39d   : > { %vm1620_vm0 = vcmp.ge.f32.partialorder %v1604_v53, 0.0  ;;  %v1636_v39 = vmul.f32 0.2, %v1604_v53  ;;  %v2085_v55 = vadd.f32 %v2030_v37, %v3178_v44 }
 0x39e   : > { %v1653_v19 = vsel %vm1621_vm15, %v1605_v36, %v1637_v45  ;;  %v2102_v18 = vadd.f32 %v2086_v15, %v3321_v2  ;;  %v3616_v45 = vld [vmem:[#allocation9_spill] sm:$0xff] }
 0x39f   : > { %1669 = vst.msk [vmem:[%s2981_s1 + $0x38] sm:$0xff] %vm1388_vm2, %v1653_v19  ;;  %v1652_v1 = vsel %vm1620_vm0, %v1604_v53, %v1636_v39  ;;  %v2101_v8 = vadd.f32 %v2085_v55, %v3311_v54  ;;  %v2620_v34 = vpop.f32.mrb[8].mxu0  ;;  %v3617_v39 = vld [vmem:[#allocation8_spill] sm:$0xff] }
 0x3a0   : > { %1668 = vst.msk [vmem:[%s2981_s1 + $0x30] sm:$0xff] %vm1388_vm2, %v1652_v1  ;;  %vm2118_vm1 = vcmp.ge.f32.partialorder %v2102_v18, 0.0  ;;  %v2134_v50 = vmul.f32 0.2, %v2102_v18  ;;  %v1591_v11 = vadd.f32 %v2620_v34, %v3196_v57  ;;  %v1543_v26 = vpop.f32.mrb[9].mxu0 }
 0x3a1   : > { %vm2117_vm3 = vcmp.ge.f32.partialorder %v2101_v8, 0.0  ;;  %v2133_v44 = vmul.f32 0.2, %v2101_v8  ;;  %v1590_v28 = vadd.f32 %v1543_v26, %v3188_v51  ;;  %v3620_v26 = vld [vmem:[#allocation12_spill] sm:$0xff] }
 0x3a2   : > { %v2150_v6 = vsel %vm2118_vm1, %v2102_v18, %v2134_v50  ;;  %v1607_v2 = vadd.f32 %v1591_v11, %v3348_v0 }
 0x3a3   : > { %2166 = vst.msk [vmem:[%s2986_s16 + $0x38] sm:$0xff] %vm1388_vm2, %v2150_v6  ;;  %v2149_v54 = vsel %vm2117_vm3, %v2101_v8, %v2133_v44  ;;  %v1606_v20 = vadd.f32 %v1590_v28, %v3338_v42  ;;  %v2652_v4 = vpop.f32.mrb[8].mxu1  ;;  %v3619_v8 = vld [vmem:[#allocation14_spill] sm:$0xff] }
 0x3a4   : > { %2165 = vst.msk [vmem:[%s2986_s16 + $0x30] sm:$0xff] %vm1388_vm2, %v2149_v54  ;;  %vm1623_vm4 = vcmp.ge.f32.partialorder %v1607_v2, 0.0  ;;  %v1639_v57 = vmul.f32 0.2, %v1607_v2  ;;  %v2088_v60 = vadd.f32 %v2652_v4, %v3202_v62  ;;  %v2040_v10 = vpop.f32.mrb[9].mxu1  ;;  %v3622_v4 = vld [vmem:[#allocation20_spill] sm:$0xff] }
 0x3a5   : > { %vm1622_vm5 = vcmp.ge.f32.partialorder %v1606_v20, 0.0  ;;  %v1638_v51 = vmul.f32 0.2, %v1606_v20  ;;  %v2087_v61 = vadd.f32 %v2040_v10, %v3194_v56  ;;  %v3623_v10 = vld [vmem:[#allocation18_spill] sm:$0xff] }
 0x3a6   : > { %v1655_v52 = vsel %vm1623_vm4, %v1607_v2, %v1639_v57  ;;  %v2104_v0 = vadd.f32 %v2088_v60, %v3341_v43  ;;  %v3621_v2 = vld [vmem:[#allocation10_spill] sm:$0xff] }
 0x3a7   : > { %1671 = vst.msk [vmem:[%s2981_s1 + $0x48] sm:$0xff] %vm1388_vm2, %v1655_v52  ;;  %v1654_v42 = vsel %vm1622_vm5, %v1606_v20, %v1638_v51  ;;  %v2103_v14 = vadd.f32 %v2087_v61, %v3331_v25  ;;  %v2623_v33 = vpop.f32.mrb[10].mxu0 }
 0x3a8   : > { %1670 = vst.msk [vmem:[%s2981_s1 + $0x40] sm:$0xff] %vm1388_vm2, %v1654_v42  ;;  %vm2120_vm6 = vcmp.ge.f32.partialorder %v2104_v0, 0.0  ;;  %v2136_v62 = vmul.f32 0.2, %v2104_v0  ;;  %v1593_v12 = vadd.f32 %v2623_v33, %v3212_v7  ;;  %v1553_v17 = vpop.f32.mrb[11].mxu0 }
 0x3a9   : > { %vm2119_vm7 = vcmp.ge.f32.partialorder %v2103_v14, 0.0  ;;  %v2135_v56 = vmul.f32 0.2, %v2103_v14  ;;  %v1592_v27 = vadd.f32 %v1553_v17, %v3204_v63 }
 0x3aa   : > { %v2152_v9 = vsel %vm2120_vm6, %v2104_v0, %v2136_v62  ;;  %v1609_v43 = vadd.f32 %v1593_v12, %v3368_v59  ;;  %v3624_v0 = vld [vmem:[#allocation13_spill] sm:$0xff]  ;;  %v3625_v62 = vld [vmem:[#allocation11_spill] sm:$0xff] }
 0x3ab   : > { %2168 = vst.msk [vmem:[%s2986_s16 + $0x48] sm:$0xff] %vm1388_vm2, %v2152_v9  ;;  %v2151_v25 = vsel %vm2119_vm7, %v2103_v14, %v2135_v56  ;;  %v1608_v40 = vadd.f32 %v1592_v27, %v3358_v29  ;;  %v2655_v49 = vpop.f32.mrb[10].mxu1  ;;  %v3626_v56 = vld [vmem:[#allocation19_spill] sm:$0xff] }
 0x3ac   : > { %2167 = vst.msk [vmem:[%s2986_s16 + $0x40] sm:$0xff] %vm1388_vm2, %v2151_v25  ;;  %vm1625_vm8 = vcmp.ge.f32.partialorder %v1609_v43, 0.0  ;;  %v1641_v7 = vmul.f32 0.2, %v1609_v43  ;;  %v2090_v35 = vadd.f32 %v2655_v49, %v3218_v13  ;;  %v2050_v58 = vpop.f32.mrb[11].mxu1 }
 0x3ad   : > { %vm1624_vm9 = vcmp.ge.f32.partialorder %v1608_v40, 0.0  ;;  %v1640_v63 = vmul.f32 0.2, %v1608_v40  ;;  %v2089_v23 = vadd.f32 %v2050_v58, %v3210_v5 }
 0x3ae   : > { %v1657_v38 = vsel %vm1625_vm8, %v1609_v43, %v1641_v7  ;;  %v2106_v59 = vadd.f32 %v2090_v35, %v3361_v30  ;;  %v3627_v43 = vld [vmem:[#allocation17_spill] sm:$0xff] }
 0x3af   : > { %1673 = vst.msk [vmem:[%s2981_s1 + $0x58] sm:$0xff] %vm1388_vm2, %v1657_v38  ;;  %v1656_v29 = vsel %vm1624_vm9, %v1608_v40, %v1640_v63  ;;  %v2105_v31 = vadd.f32 %v2089_v23, %v3351_v3  ;;  %v2626_v46 = vpop.f32.mrb[12].mxu0 }
 0x3b0   : > { %1672 = vst.msk [vmem:[%s2981_s1 + $0x50] sm:$0xff] %vm1388_vm2, %v1656_v29  ;;  %vm2122_vm10 = vcmp.ge.f32.partialorder %v2106_v59, 0.0  ;;  %v2138_v13 = vmul.f32 0.2, %v2106_v59  ;;  %v1595_v32 = vadd.f32 %v2626_v46, %v3228_v24  ;;  %v1563_v47 = vpop.f32.mrb[13].mxu0 }
 0x3b1   : > { %vm2121_vm11 = vcmp.ge.f32.partialorder %v2105_v31, 0.0  ;;  %v2137_v5 = vmul.f32 0.2, %v2105_v31  ;;  %v1594_v21 = vadd.f32 %v1563_v47, %v3220_v16 }
 0x3b2   : > { %v2154_v36 = vsel %vm2122_vm10, %v2106_v59, %v2138_v13  ;;  %v1611_v30 = vadd.f32 %v1595_v32, %v3388_v41  ;;  %v3618_v41 = vld [vmem:[#allocation16_spill] sm:$0xff] }
 0x3b3   : > { %2170 = vst.msk [vmem:[%s2986_s16 + $0x58] sm:$0xff] %vm1388_vm2, %v2154_v36  ;;  %v2153_v3 = vsel %vm2121_vm11, %v2105_v31, %v2137_v5  ;;  %v1610_v53 = vadd.f32 %v1594_v21, %v3615_v22  ;;  %v2658_v48 = vpop.f32.mrb[12].mxu1 }
 0x3b4   : > { %2169 = vst.msk [vmem:[%s2986_s16 + $0x50] sm:$0xff] %vm1388_vm2, %v2153_v3  ;;  %vm1627_vm12 = vcmp.ge.f32.partialorder %v1611_v30, 0.0  ;;  %v1643_v24 = vmul.f32 0.2, %v1611_v30  ;;  %v2092_v15 = vadd.f32 %v2658_v48, %v3616_v45  ;;  %v2060_v37 = vpop.f32.mrb[13].mxu1 }
 0x3b5   : > { %vm1626_vm13 = vcmp.ge.f32.partialorder %v1610_v53, 0.0  ;;  %v1642_v16 = vmul.f32 0.2, %v1610_v53  ;;  %v2091_v55 = vadd.f32 %v2060_v37, %v3617_v39 }
 0x3b6   : > { %v1659_v19 = vsel %vm1627_vm12, %v1611_v30, %v1643_v24  ;;  %v2108_v18 = vadd.f32 %v2092_v15, %v3618_v41 }
 0x3b7   : > { %1675 = vst.msk [vmem:[%s2981_s1 + $0x68] sm:$0xff] %vm1388_vm2, %v1659_v19  ;;  %v1658_v1 = vsel %vm1626_vm13, %v1610_v53, %v1642_v16  ;;  %v2107_v34 = vadd.f32 %v2091_v55, %v3619_v8  ;;  %v2629_v50 = vpop.f32.mrb[14].mxu0 }
 0x3b8   : > { %1674 = vst.msk [vmem:[%s2981_s1 + $0x60] sm:$0xff] %vm1388_vm2, %v1658_v1  ;;  %vm2124_vm14 = vcmp.ge.f32.partialorder %v2108_v18, 0.0  ;;  %v2140_v11 = vmul.f32 0.2, %v2108_v18  ;;  %v1597_v44 = vadd.f32 %v2629_v50, %v3620_v26  ;;  %v1573_v28 = vpop.f32.mrb[15].mxu0 }
 0x3b9   : > { %vm2123_vm15 = vcmp.ge.f32.partialorder %v2107_v34, 0.0  ;;  %v2139_v6 = vmul.f32 0.2, %v2107_v34  ;;  %v1596_v54 = vadd.f32 %v1573_v28, %v3621_v2 }
 0x3ba   : > { %v2156_v20 = vsel %vm2124_vm14, %v2108_v18, %v2140_v11  ;;  %v1613_v57 = vadd.f32 %v1597_v44, %v3622_v4 }
 0x3bb   : > { %2172 = vst.msk [vmem:[%s2986_s16 + $0x68] sm:$0xff] %vm1388_vm2, %v2156_v20  ;;  %v2155_v60 = vsel %vm2123_vm15, %v2107_v34, %v2139_v6  ;;  %v1612_v51 = vadd.f32 %v1596_v54, %v3623_v10  ;;  %v2661_v61 = vpop.f32.mrb[14].mxu1 }
 0x3bc   : > { %2171 = vst.msk [vmem:[%s2986_s16 + $0x60] sm:$0xff] %vm1388_vm2, %v2155_v60  ;;  %vm1629_vm0 = vcmp.ge.f32.partialorder %v1613_v57, 0.0  ;;  %v1645_v52 = vmul.f32 0.2, %v1613_v57  ;;  %v2094_v42 = vadd.f32 %v2661_v61, %v3624_v0  ;;  %v2070_v14 = vpop.f32.mrb[15].mxu1 }
 0x3bd   : > { %vm1628_vm1 = vcmp.ge.f32.partialorder %v1612_v51, 0.0  ;;  %v1644_v33 = vmul.f32 0.2, %v1612_v51  ;;  %v2093_v12 = vadd.f32 %v2070_v14, %v3625_v62 }
 0x3be   : > { %v1661_v17 = vsel %vm1629_vm0, %v1613_v57, %v1645_v52  ;;  %v2110_v27 = vadd.f32 %v2094_v42, %v3626_v56 }
 0x3bf   : > { %1677 = vst.msk [vmem:[%s2981_s1 + $0x78] sm:$0xff] %vm1388_vm2, %v1661_v17  ;;  %v1660_v9 = vsel %vm1628_vm1, %v1612_v51, %v1644_v33  ;;  %v2109_v25 = vadd.f32 %v2093_v12, %v3627_v43 }
 0x3c0   : > { %1676 = vst.msk [vmem:[%s2981_s1 + $0x70] sm:$0xff] %vm1388_vm2, %v1660_v9  ;;  %vm2126_vm3 = vcmp.ge.f32.partialorder %v2110_v27, 0.0  ;;  %v2142_v40 = vmul.f32 0.2, %v2110_v27 }
 0x3c1   : > { %vm2125_vm4 = vcmp.ge.f32.partialorder %v2109_v25, 0.0  ;;  %v2141_v49 = vmul.f32 0.2, %v2109_v25 }
 0x3c2   : > { %v2158_v7 = vsel %vm2126_vm3, %v2110_v27, %v2142_v40 }
 0x3c3   : > { %2174 = vst.msk [vmem:[%s2986_s16 + $0x78] sm:$0xff] %vm1388_vm2, %v2158_v7  ;;  %v2157_v35 = vsel %vm2125_vm4, %v2109_v25, %v2141_v49 }
 0x3c4   : > { %2173 = vst.msk [vmem:[%s2986_s16 + $0x70] sm:$0xff] %vm1388_vm2, %v2157_v35 }
 0x3c5 PF: > { %s21_s19 = sadd.s32 1, %s2809_s19   ;;  %s3628_s20 = sld [smem:[#allocation6_spill]] }
 0x3c6   : > { %p18_p0 = scmp.ge.s32.totalorder %s21_s19, 6   ;;  %s3629_s22 = sld [smem:[#allocation7_spill]] }
 0x3c7   : > { %s3630_s13 = smov %s2789_s14  ;;  %s3631_s14 = smov %s2924_s27 }
 0x3c8   : > { %s3632_s15 = smov %s2801_s17  ;;  %s3633_s16 = smov %s2805_s18 }
 0x3c9   :  { %20 = sbr.rel (!%p18_p0) target bundleno = 10 (0xa), region = 213 }
 0x3cb   : > { %s3634_s17 = smov %s3628_s20 }
 0x3cc   : > { %s3635_s18 = smov %s3629_s22 }

</bundles_post_ra>
